<compile_context>
chip_gen: v5e
topology: v5e:2x2
jax: 0.10.0
libtpu: 0.0.40
codegen_flags: <defaults>
</compile_context>

<pallas_src>
import functools

import jax
import jax.numpy as jnp
import numpy as np
from jax.experimental import pallas as pl
from jax.experimental.pallas import tpu as pltpu

# ----------------------------- config ---------------------------------------
B = 256            # demo batch (2 grid steps at BM=128 -> both v7x cores busy)
INPUT_SIZE = 16    # flattened input size (L * input_dim)
HIDDEN = 32        # block_hidden
N_LAYERS = 4       # fc layers per block
NUM_BLOCKS = 3     # blocks in the stack

THETA = INPUT_SIZE + 1   # last_fc width (backcast rows | forecast row)
BM = 128                 # batch tile on the LANE axis (sweep 128-512 if batch grows)

# Transposed slab layout, per block (rows = output features, lanes = [W^T | b]):
#   rows [0, HIDDEN)                 : [w_in^T  | b_in ]  (HIDDEN, INPUT_SIZE+1)
#   rows [HIDDEN*(1+l), ...)         : [w_hid^T | b_hid]  (HIDDEN, HIDDEN+1)  x (N_LAYERS-1)
#   rows [N_LAYERS*HIDDEN, ..+THETA) : [w_th^T  | b_th ]  (THETA,  HIDDEN+1)
SLAB_W = HIDDEN + 1
_ROWS_RAW = HIDDEN + (N_LAYERS - 1) * HIDDEN + THETA
ROWS_PER_BLOCK = -(-_ROWS_RAW // 8) * 8          # sublane-align each block's base
TOTAL_ROWS = NUM_BLOCKS * ROWS_PER_BLOCK         # multiple of 8


# ----------------------------- kernel ---------------------------------------
def nbeats_stack_kernel(x_ref, w_ref, out_ref):
    """x_ref: (INPUT_SIZE, BM); w_ref: (TOTAL_ROWS, SLAB_W); out_ref: (1, BM)."""
    residual = x_ref[...].astype(jnp.float32)            # (INPUT_SIZE, BM)
    bm = residual.shape[1]
    forecast = jnp.zeros((1, bm), jnp.float32)

    for blk in range(NUM_BLOCKS):
        off = blk * ROWS_PER_BLOCK

        # input layer: h = relu(W_in^T @ residual + b_in)
        w = w_ref[off:off + HIDDEN, 0:INPUT_SIZE]                # (HIDDEN, INPUT_SIZE)
        b = w_ref[off:off + HIDDEN, INPUT_SIZE:INPUT_SIZE + 1]   # (HIDDEN, 1)
        h = jnp.maximum(
            jnp.dot(w, residual, preferred_element_type=jnp.float32) + b, 0.0)
        off += HIDDEN

        # hidden layers: Linear + ReLU
        for _ in range(N_LAYERS - 1):
            w = w_ref[off:off + HIDDEN, 0:HIDDEN]                # (HIDDEN, HIDDEN)
            b = w_ref[off:off + HIDDEN, HIDDEN:HIDDEN + 1]       # (HIDDEN, 1)
            h = jnp.maximum(
                jnp.dot(w, h, preferred_element_type=jnp.float32) + b, 0.0)
            off += HIDDEN

        # fused last_fc: theta = (backcast rows | forecast row), split on sublanes
        w = w_ref[off:off + THETA, 0:HIDDEN]                     # (THETA, HIDDEN)
        b = w_ref[off:off + THETA, HIDDEN:HIDDEN + 1]            # (THETA, 1)
        theta = jnp.dot(w, h, preferred_element_type=jnp.float32) + b   # (THETA, BM)

        residual = residual - theta[:INPUT_SIZE, :]
        forecast = forecast + theta[INPUT_SIZE:, :]

    # Lane-dense (1, BM) store; no broadcast, no wrapper column slice needed.
    out_ref[...] = forecast.astype(out_ref.dtype)


# ----------------------------- packing --------------------------------------
def pack_params(params):
    """Pack all per-block weights (transposed, bias as extra lane column) into
    one (TOTAL_ROWS, SLAB_W) f32 slab."""
    w_in, b_in, w_hid, b_hid, w_theta, b_theta = params
    slab = np.zeros((TOTAL_ROWS, SLAB_W), np.float32)
    for blk in range(NUM_BLOCKS):
        base = blk * ROWS_PER_BLOCK
        slab[base:base + HIDDEN, :INPUT_SIZE] = np.asarray(w_in[blk]).T
        slab[base:base + HIDDEN, INPUT_SIZE] = np.asarray(b_in[blk]).reshape(-1)
        off = base + HIDDEN
        for layer in range(N_LAYERS - 1):
            slab[off:off + HIDDEN, :HIDDEN] = np.asarray(w_hid[blk, layer]).T
            slab[off:off + HIDDEN, HIDDEN] = np.asarray(b_hid[blk, layer]).reshape(-1)
            off += HIDDEN
        slab[off:off + THETA, :HIDDEN] = np.asarray(w_theta[blk]).T
        slab[off:off + THETA, HIDDEN] = np.asarray(b_theta[blk]).reshape(-1)
    return jnp.asarray(slab)


# ----------------------------- wrapper ---------------------------------------
@functools.partial(jax.jit, static_argnames=("single_buffer_weights",))
def nbeats_stack_forward(x, slab, single_buffer_weights=True):
    batch = x.shape[0]
    padded = pl.cdiv(batch, BM) * BM

    # Batch-on-lanes layout: pass x^T, pad batch up to a multiple of BM.
    x_t = jnp.zeros((INPUT_SIZE, padded), jnp.float32)
    x_t = x_t.at[:, :batch].set(x.astype(jnp.float32).T)

    if single_buffer_weights:
        w_spec = pl.BlockSpec((TOTAL_ROWS, SLAB_W), lambda i: (0, 0),
                              pipeline_mode=pl.Buffered(1))
    else:
        w_spec = pl.BlockSpec((TOTAL_ROWS, SLAB_W), lambda i: (0, 0))

    flops = 2 * padded * NUM_BLOCKS * (
        INPUT_SIZE * HIDDEN + (N_LAYERS - 1) * HIDDEN * HIDDEN + HIDDEN * THETA)
    bytes_accessed = (x_t.size + slab.size + padded) * 4
    cost = pl.CostEstimate(flops=flops, transcendentals=0,
                           bytes_accessed=bytes_accessed)

    out = pl.pallas_call(
        nbeats_stack_kernel,
        out_shape=jax.ShapeDtypeStruct((1, padded), jnp.float32),
        grid_spec=pltpu.PrefetchScalarGridSpec(
            num_scalar_prefetch=0,
            grid=(padded // BM,),
            in_specs=[
                pl.BlockSpec((INPUT_SIZE, BM), lambda i: (0, i)),  # x^T batch tile
                w_spec,                                            # resident weights
            ],
            out_specs=pl.BlockSpec((1, BM), lambda i: (0, i)),     # forecast row
        ),
        compiler_params=pltpu.CompilerParams(
            dimension_semantics=("parallel",)),
        cost_estimate=cost,
    )(x_t, slab)

    return out[0, :batch].reshape(batch, 1)


# ----------------------------- param init ------------------------------------
def init_params(key):
    """Deterministic synthetic params mirroring the PyTorch module shapes."""
    ks = jax.random.split(key, 6)
    theta_scale = 1.0 / np.sqrt(HIDDEN)

    w_in = jax.random.uniform(ks[0], (NUM_BLOCKS, INPUT_SIZE, HIDDEN),
                              jnp.float32, -1, 1) / np.sqrt(INPUT_SIZE)
    b_in = jax.random.uniform(ks[1], (NUM_BLOCKS, 1, HIDDEN),
                              jnp.float32, -1, 1) / np.sqrt(INPUT_SIZE)
    w_hid = jax.random.uniform(ks[2], (NUM_BLOCKS, N_LAYERS - 1, HIDDEN, HIDDEN),
                               jnp.float32, -1, 1) / np.sqrt(HIDDEN)
    b_hid = jax.random.uniform(ks[3], (NUM_BLOCKS, N_LAYERS - 1, 1, HIDDEN),
                               jnp.float32, -1, 1) / np.sqrt(HIDDEN)
    # last_fc weight/bias of width input_size+1 (backcast cols | forecast col)
    w_theta = jax.random.uniform(ks[4], (NUM_BLOCKS, HIDDEN, THETA),
                                 jnp.float32, -1, 1) * theta_scale
    b_theta = jax.random.uniform(ks[5], (NUM_BLOCKS, 1, THETA),
                                 jnp.float32, -1, 1) * theta_scale
    return (w_in, b_in, w_hid, b_hid, w_theta, b_theta)


# ----------------------------- pure-JAX reference -----------------------------
def nbeats_stack_reference(x, params):
    w_in, b_in, w_hid, b_hid, w_theta, b_theta = params
    residual = x.astype(jnp.float32)
    forecast = jnp.zeros((x.shape[0], 1), jnp.float32)
    for blk in range(NUM_BLOCKS):
        h = jnp.maximum(residual @ w_in[blk] + b_in[blk], 0.0)
        for layer in range(N_LAYERS - 1):
            h = jnp.maximum(h @ w_hid[blk, layer] + b_hid[blk, layer], 0.0)
        theta = h @ w_theta[blk] + b_theta[blk]
        residual = residual - theta[:, :INPUT_SIZE]
        forecast = forecast + theta[:, INPUT_SIZE:]
    return forecast


# ----------------------------- main ------------------------------------------
if __name__ == "__main__":
    key = jax.random.PRNGKey(0)
    kx, kp = jax.random.split(key)
    x = jax.random.normal(kx, (B, INPUT_SIZE), jnp.float32)
    params = init_params(kp)
    slab = pack_params(params)

    ref = np.asarray(nbeats_stack_reference(x, params))

    def run_and_check(single_buffer):
        out = nbeats_stack_forward(x, slab, single_buffer_weights=single_buffer)
        out = jax.block_until_ready(out)
        np.testing.assert_allclose(np.asarray(out), ref, rtol=1e-4, atol=1e-5)
        return out

    try:
        out = run_and_check(True)      # single-buffered resident weight slab
    except Exception:
        out = run_and_check(False)     # fallback: default double-buffered spec

    assert out.shape == (B, 1)
    print("KERNEL_OK")
</pallas_src>

<mosaic_0001>
module attributes {stable_mosaic.version = 11 : i64} {
  func.func @nbeats_stack_kernel(%arg0: i32, %arg1: memref<16x128xf32, #tpu.memory_space<vmem>>, %arg2: memref<456x33xf32, #tpu.memory_space<vmem>>, %arg3: memref<1x128xf32, #tpu.memory_space<vmem>>) attributes {dimension_semantics = [#tpu.dimension_semantics<parallel>], iteration_bounds = array<i64: 2>, scalar_prefetch = 0 : i64, scratch_operands = 0 : i64, tpu.core_type = #tpu.core_type<tc>, window_params = [{transform_indices = @transform_0, window_bounds = array<i64: 16, 128>}, {pipeline_mode = #tpu.pipeline_mode<synchronous>, transform_indices = @transform_1, window_bounds = array<i64: 456, 33>}, {transform_indices = @transform_2, window_bounds = array<i64: 1, 128>}]} {
    %c0 = arith.constant 0 : index
    %c0_0 = arith.constant 0 : index
    %0 = vector.load %arg1[%c0, %c0_0] : memref<16x128xf32, #tpu.memory_space<vmem>>, vector<16x128xf32>
    %cst = arith.constant 0.000000e+00 : f32
    %1 = vector.broadcast %cst : f32 to vector<1x128xf32>
    %c0_1 = arith.constant 0 : index
    %c0_2 = arith.constant 0 : index
    %2 = vector.load %arg2[%c0_1, %c0_2] : memref<456x33xf32, #tpu.memory_space<vmem>>, vector<32x16xf32>
    %c0_3 = arith.constant 0 : index
    %c16 = arith.constant 16 : index
    %3 = vector.load %arg2[%c0_3, %c16] : memref<456x33xf32, #tpu.memory_space<vmem>>, vector<32x1xf32>
    %cst_4 = arith.constant dense<0.000000e+00> : vector<32x128xf32>
    %4 = tpu.matmul %2, %0, %cst_4 {dimension_numbers = #tpu.dot_dimension_numbers<[1], [0], [0], [1], [0, 0, 1, 1], [], []>} : vector<32x16xf32>, vector<16x128xf32>, vector<32x128xf32> -> vector<32x128xf32>
    %5 = vector.broadcast %3 : vector<32x1xf32> to vector<32x128xf32>
    %6 = arith.addf %4, %5 : vector<32x128xf32>
    %cst_5 = arith.constant 0.000000e+00 : f32
    %7 = vector.broadcast %cst_5 : f32 to vector<32x128xf32>
    %8 = arith.maximumf %6, %7 : vector<32x128xf32>
    %c32 = arith.constant 32 : index
    %c0_6 = arith.constant 0 : index
    %9 = vector.load %arg2[%c32, %c0_6] : memref<456x33xf32, #tpu.memory_space<vmem>>, vector<32x32xf32>
    %c32_7 = arith.constant 32 : index
    %c32_8 = arith.constant 32 : index
    %10 = vector.load %arg2[%c32_7, %c32_8] : memref<456x33xf32, #tpu.memory_space<vmem>>, vector<32x1xf32>
    %cst_9 = arith.constant dense<0.000000e+00> : vector<32x128xf32>
    %11 = tpu.matmul %9, %8, %cst_9 {dimension_numbers = #tpu.dot_dimension_numbers<[1], [0], [0], [1], [0, 0, 1, 1], [], []>} : vector<32x32xf32>, vector<32x128xf32>, vector<32x128xf32> -> vector<32x128xf32>
    %12 = vector.broadcast %10 : vector<32x1xf32> to vector<32x128xf32>
    %13 = arith.addf %11, %12 : vector<32x128xf32>
    %cst_10 = arith.constant 0.000000e+00 : f32
    %14 = vector.broadcast %cst_10 : f32 to vector<32x128xf32>
    %15 = arith.maximumf %13, %14 : vector<32x128xf32>
    %c64 = arith.constant 64 : index
    %c0_11 = arith.constant 0 : index
    %16 = vector.load %arg2[%c64, %c0_11] : memref<456x33xf32, #tpu.memory_space<vmem>>, vector<32x32xf32>
    %c64_12 = arith.constant 64 : index
    %c32_13 = arith.constant 32 : index
    %17 = vector.load %arg2[%c64_12, %c32_13] : memref<456x33xf32, #tpu.memory_space<vmem>>, vector<32x1xf32>
    %cst_14 = arith.constant dense<0.000000e+00> : vector<32x128xf32>
    %18 = tpu.matmul %16, %15, %cst_14 {dimension_numbers = #tpu.dot_dimension_numbers<[1], [0], [0], [1], [0, 0, 1, 1], [], []>} : vector<32x32xf32>, vector<32x128xf32>, vector<32x128xf32> -> vector<32x128xf32>
    %19 = vector.broadcast %17 : vector<32x1xf32> to vector<32x128xf32>
    %20 = arith.addf %18, %19 : vector<32x128xf32>
    %cst_15 = arith.constant 0.000000e+00 : f32
    %21 = vector.broadcast %cst_15 : f32 to vector<32x128xf32>
    %22 = arith.maximumf %20, %21 : vector<32x128xf32>
    %c96 = arith.constant 96 : index
    %c0_16 = arith.constant 0 : index
    %23 = vector.load %arg2[%c96, %c0_16] : memref<456x33xf32, #tpu.memory_space<vmem>>, vector<32x32xf32>
    %c96_17 = arith.constant 96 : index
    %c32_18 = arith.constant 32 : index
    %24 = vector.load %arg2[%c96_17, %c32_18] : memref<456x33xf32, #tpu.memory_space<vmem>>, vector<32x1xf32>
    %cst_19 = arith.constant dense<0.000000e+00> : vector<32x128xf32>
    %25 = tpu.matmul %23, %22, %cst_19 {dimension_numbers = #tpu.dot_dimension_numbers<[1], [0], [0], [1], [0, 0, 1, 1], [], []>} : vector<32x32xf32>, vector<32x128xf32>, vector<32x128xf32> -> vector<32x128xf32>
    %26 = vector.broadcast %24 : vector<32x1xf32> to vector<32x128xf32>
    %27 = arith.addf %25, %26 : vector<32x128xf32>
    %cst_20 = arith.constant 0.000000e+00 : f32
    %28 = vector.broadcast %cst_20 : f32 to vector<32x128xf32>
    %29 = arith.maximumf %27, %28 : vector<32x128xf32>
    %c128 = arith.constant 128 : index
    %c0_21 = arith.constant 0 : index
    %30 = vector.load %arg2[%c128, %c0_21] : memref<456x33xf32, #tpu.memory_space<vmem>>, vector<17x32xf32>
    %c128_22 = arith.constant 128 : index
    %c32_23 = arith.constant 32 : index
    %31 = vector.load %arg2[%c128_22, %c32_23] : memref<456x33xf32, #tpu.memory_space<vmem>>, vector<17x1xf32>
    %cst_24 = arith.constant dense<0.000000e+00> : vector<17x128xf32>
    %32 = tpu.matmul %30, %29, %cst_24 {dimension_numbers = #tpu.dot_dimension_numbers<[1], [0], [0], [1], [0, 0, 1, 1], [], []>} : vector<17x32xf32>, vector<32x128xf32>, vector<17x128xf32> -> vector<17x128xf32>
    %33 = vector.broadcast %31 : vector<17x1xf32> to vector<17x128xf32>
    %34 = arith.addf %32, %33 : vector<17x128xf32>
    %35 = vector.extract_strided_slice %34 {offsets = [0, 0], sizes = [16, 128], strides = [1, 1]} : vector<17x128xf32> to vector<16x128xf32>
    %36 = arith.subf %0, %35 : vector<16x128xf32>
    %37 = vector.extract_strided_slice %34 {offsets = [16, 0], sizes = [1, 128], strides = [1, 1]} : vector<17x128xf32> to vector<1x128xf32>
    %38 = arith.addf %1, %37 : vector<1x128xf32>
    %c152 = arith.constant 152 : index
    %c0_25 = arith.constant 0 : index
    %39 = vector.load %arg2[%c152, %c0_25] : memref<456x33xf32, #tpu.memory_space<vmem>>, vector<32x16xf32>
    %c152_26 = arith.constant 152 : index
    %c16_27 = arith.constant 16 : index
    %40 = vector.load %arg2[%c152_26, %c16_27] : memref<456x33xf32, #tpu.memory_space<vmem>>, vector<32x1xf32>
    %cst_28 = arith.constant dense<0.000000e+00> : vector<32x128xf32>
    %41 = tpu.matmul %39, %36, %cst_28 {dimension_numbers = #tpu.dot_dimension_numbers<[1], [0], [0], [1], [0, 0, 1, 1], [], []>} : vector<32x16xf32>, vector<16x128xf32>, vector<32x128xf32> -> vector<32x128xf32>
    %42 = vector.broadcast %40 : vector<32x1xf32> to vector<32x128xf32>
    %43 = arith.addf %41, %42 : vector<32x128xf32>
    %cst_29 = arith.constant 0.000000e+00 : f32
    %44 = vector.broadcast %cst_29 : f32 to vector<32x128xf32>
    %45 = arith.maximumf %43, %44 : vector<32x128xf32>
    %c184 = arith.constant 184 : index
    %c0_30 = arith.constant 0 : index
    %46 = vector.load %arg2[%c184, %c0_30] : memref<456x33xf32, #tpu.memory_space<vmem>>, vector<32x32xf32>
    %c184_31 = arith.constant 184 : index
    %c32_32 = arith.constant 32 : index
    %47 = vector.load %arg2[%c184_31, %c32_32] : memref<456x33xf32, #tpu.memory_space<vmem>>, vector<32x1xf32>
    %cst_33 = arith.constant dense<0.000000e+00> : vector<32x128xf32>
    %48 = tpu.matmul %46, %45, %cst_33 {dimension_numbers = #tpu.dot_dimension_numbers<[1], [0], [0], [1], [0, 0, 1, 1], [], []>} : vector<32x32xf32>, vector<32x128xf32>, vector<32x128xf32> -> vector<32x128xf32>
    %49 = vector.broadcast %47 : vector<32x1xf32> to vector<32x128xf32>
    %50 = arith.addf %48, %49 : vector<32x128xf32>
    %cst_34 = arith.constant 0.000000e+00 : f32
    %51 = vector.broadcast %cst_34 : f32 to vector<32x128xf32>
    %52 = arith.maximumf %50, %51 : vector<32x128xf32>
    %c216 = arith.constant 216 : index
    %c0_35 = arith.constant 0 : index
    %53 = vector.load %arg2[%c216, %c0_35] : memref<456x33xf32, #tpu.memory_space<vmem>>, vector<32x32xf32>
    %c216_36 = arith.constant 216 : index
    %c32_37 = arith.constant 32 : index
    %54 = vector.load %arg2[%c216_36, %c32_37] : memref<456x33xf32, #tpu.memory_space<vmem>>, vector<32x1xf32>
    %cst_38 = arith.constant dense<0.000000e+00> : vector<32x128xf32>
    %55 = tpu.matmul %53, %52, %cst_38 {dimension_numbers = #tpu.dot_dimension_numbers<[1], [0], [0], [1], [0, 0, 1, 1], [], []>} : vector<32x32xf32>, vector<32x128xf32>, vector<32x128xf32> -> vector<32x128xf32>
    %56 = vector.broadcast %54 : vector<32x1xf32> to vector<32x128xf32>
    %57 = arith.addf %55, %56 : vector<32x128xf32>
    %cst_39 = arith.constant 0.000000e+00 : f32
    %58 = vector.broadcast %cst_39 : f32 to vector<32x128xf32>
    %59 = arith.maximumf %57, %58 : vector<32x128xf32>
    %c248 = arith.constant 248 : index
    %c0_40 = arith.constant 0 : index
    %60 = vector.load %arg2[%c248, %c0_40] : memref<456x33xf32, #tpu.memory_space<vmem>>, vector<32x32xf32>
    %c248_41 = arith.constant 248 : index
    %c32_42 = arith.constant 32 : index
    %61 = vector.load %arg2[%c248_41, %c32_42] : memref<456x33xf32, #tpu.memory_space<vmem>>, vector<32x1xf32>
    %cst_43 = arith.constant dense<0.000000e+00> : vector<32x128xf32>
    %62 = tpu.matmul %60, %59, %cst_43 {dimension_numbers = #tpu.dot_dimension_numbers<[1], [0], [0], [1], [0, 0, 1, 1], [], []>} : vector<32x32xf32>, vector<32x128xf32>, vector<32x128xf32> -> vector<32x128xf32>
    %63 = vector.broadcast %61 : vector<32x1xf32> to vector<32x128xf32>
    %64 = arith.addf %62, %63 : vector<32x128xf32>
    %cst_44 = arith.constant 0.000000e+00 : f32
    %65 = vector.broadcast %cst_44 : f32 to vector<32x128xf32>
    %66 = arith.maximumf %64, %65 : vector<32x128xf32>
    %c280 = arith.constant 280 : index
    %c0_45 = arith.constant 0 : index
    %67 = vector.load %arg2[%c280, %c0_45] : memref<456x33xf32, #tpu.memory_space<vmem>>, vector<17x32xf32>
    %c280_46 = arith.constant 280 : index
    %c32_47 = arith.constant 32 : index
    %68 = vector.load %arg2[%c280_46, %c32_47] : memref<456x33xf32, #tpu.memory_space<vmem>>, vector<17x1xf32>
    %cst_48 = arith.constant dense<0.000000e+00> : vector<17x128xf32>
    %69 = tpu.matmul %67, %66, %cst_48 {dimension_numbers = #tpu.dot_dimension_numbers<[1], [0], [0], [1], [0, 0, 1, 1], [], []>} : vector<17x32xf32>, vector<32x128xf32>, vector<17x128xf32> -> vector<17x128xf32>
    %70 = vector.broadcast %68 : vector<17x1xf32> to vector<17x128xf32>
    %71 = arith.addf %69, %70 : vector<17x128xf32>
    %72 = vector.extract_strided_slice %71 {offsets = [0, 0], sizes = [16, 128], strides = [1, 1]} : vector<17x128xf32> to vector<16x128xf32>
    %73 = arith.subf %36, %72 : vector<16x128xf32>
    %74 = vector.extract_strided_slice %71 {offsets = [16, 0], sizes = [1, 128], strides = [1, 1]} : vector<17x128xf32> to vector<1x128xf32>
    %75 = arith.addf %38, %74 : vector<1x128xf32>
    %c304 = arith.constant 304 : index
    %c0_49 = arith.constant 0 : index
    %76 = vector.load %arg2[%c304, %c0_49] : memref<456x33xf32, #tpu.memory_space<vmem>>, vector<32x16xf32>
    %c304_50 = arith.constant 304 : index
    %c16_51 = arith.constant 16 : index
    %77 = vector.load %arg2[%c304_50, %c16_51] : memref<456x33xf32, #tpu.memory_space<vmem>>, vector<32x1xf32>
    %cst_52 = arith.constant dense<0.000000e+00> : vector<32x128xf32>
    %78 = tpu.matmul %76, %73, %cst_52 {dimension_numbers = #tpu.dot_dimension_numbers<[1], [0], [0], [1], [0, 0, 1, 1], [], []>} : vector<32x16xf32>, vector<16x128xf32>, vector<32x128xf32> -> vector<32x128xf32>
    %79 = vector.broadcast %77 : vector<32x1xf32> to vector<32x128xf32>
    %80 = arith.addf %78, %79 : vector<32x128xf32>
    %cst_53 = arith.constant 0.000000e+00 : f32
    %81 = vector.broadcast %cst_53 : f32 to vector<32x128xf32>
    %82 = arith.maximumf %80, %81 : vector<32x128xf32>
    %c336 = arith.constant 336 : index
    %c0_54 = arith.constant 0 : index
    %83 = vector.load %arg2[%c336, %c0_54] : memref<456x33xf32, #tpu.memory_space<vmem>>, vector<32x32xf32>
    %c336_55 = arith.constant 336 : index
    %c32_56 = arith.constant 32 : index
    %84 = vector.load %arg2[%c336_55, %c32_56] : memref<456x33xf32, #tpu.memory_space<vmem>>, vector<32x1xf32>
    %cst_57 = arith.constant dense<0.000000e+00> : vector<32x128xf32>
    %85 = tpu.matmul %83, %82, %cst_57 {dimension_numbers = #tpu.dot_dimension_numbers<[1], [0], [0], [1], [0, 0, 1, 1], [], []>} : vector<32x32xf32>, vector<32x128xf32>, vector<32x128xf32> -> vector<32x128xf32>
    %86 = vector.broadcast %84 : vector<32x1xf32> to vector<32x128xf32>
    %87 = arith.addf %85, %86 : vector<32x128xf32>
    %cst_58 = arith.constant 0.000000e+00 : f32
    %88 = vector.broadcast %cst_58 : f32 to vector<32x128xf32>
    %89 = arith.maximumf %87, %88 : vector<32x128xf32>
    %c368 = arith.constant 368 : index
    %c0_59 = arith.constant 0 : index
    %90 = vector.load %arg2[%c368, %c0_59] : memref<456x33xf32, #tpu.memory_space<vmem>>, vector<32x32xf32>
    %c368_60 = arith.constant 368 : index
    %c32_61 = arith.constant 32 : index
    %91 = vector.load %arg2[%c368_60, %c32_61] : memref<456x33xf32, #tpu.memory_space<vmem>>, vector<32x1xf32>
    %cst_62 = arith.constant dense<0.000000e+00> : vector<32x128xf32>
    %92 = tpu.matmul %90, %89, %cst_62 {dimension_numbers = #tpu.dot_dimension_numbers<[1], [0], [0], [1], [0, 0, 1, 1], [], []>} : vector<32x32xf32>, vector<32x128xf32>, vector<32x128xf32> -> vector<32x128xf32>
    %93 = vector.broadcast %91 : vector<32x1xf32> to vector<32x128xf32>
    %94 = arith.addf %92, %93 : vector<32x128xf32>
    %cst_63 = arith.constant 0.000000e+00 : f32
    %95 = vector.broadcast %cst_63 : f32 to vector<32x128xf32>
    %96 = arith.maximumf %94, %95 : vector<32x128xf32>
    %c400 = arith.constant 400 : index
    %c0_64 = arith.constant 0 : index
    %97 = vector.load %arg2[%c400, %c0_64] : memref<456x33xf32, #tpu.memory_space<vmem>>, vector<32x32xf32>
    %c400_65 = arith.constant 400 : index
    %c32_66 = arith.constant 32 : index
    %98 = vector.load %arg2[%c400_65, %c32_66] : memref<456x33xf32, #tpu.memory_space<vmem>>, vector<32x1xf32>
    %cst_67 = arith.constant dense<0.000000e+00> : vector<32x128xf32>
    %99 = tpu.matmul %97, %96, %cst_67 {dimension_numbers = #tpu.dot_dimension_numbers<[1], [0], [0], [1], [0, 0, 1, 1], [], []>} : vector<32x32xf32>, vector<32x128xf32>, vector<32x128xf32> -> vector<32x128xf32>
    %100 = vector.broadcast %98 : vector<32x1xf32> to vector<32x128xf32>
    %101 = arith.addf %99, %100 : vector<32x128xf32>
    %cst_68 = arith.constant 0.000000e+00 : f32
    %102 = vector.broadcast %cst_68 : f32 to vector<32x128xf32>
    %103 = arith.maximumf %101, %102 : vector<32x128xf32>
    %c432 = arith.constant 432 : index
    %c0_69 = arith.constant 0 : index
    %104 = vector.load %arg2[%c432, %c0_69] : memref<456x33xf32, #tpu.memory_space<vmem>>, vector<17x32xf32>
    %c432_70 = arith.constant 432 : index
    %c32_71 = arith.constant 32 : index
    %105 = vector.load %arg2[%c432_70, %c32_71] : memref<456x33xf32, #tpu.memory_space<vmem>>, vector<17x1xf32>
    %cst_72 = arith.constant dense<0.000000e+00> : vector<17x128xf32>
    %106 = tpu.matmul %104, %103, %cst_72 {dimension_numbers = #tpu.dot_dimension_numbers<[1], [0], [0], [1], [0, 0, 1, 1], [], []>} : vector<17x32xf32>, vector<32x128xf32>, vector<17x128xf32> -> vector<17x128xf32>
    %107 = vector.broadcast %105 : vector<17x1xf32> to vector<17x128xf32>
    %108 = arith.addf %106, %107 : vector<17x128xf32>
    %109 = vector.extract_strided_slice %108 {offsets = [16, 0], sizes = [1, 128], strides = [1, 1]} : vector<17x128xf32> to vector<1x128xf32>
    %110 = arith.addf %75, %109 : vector<1x128xf32>
    %c0_73 = arith.constant 0 : index
    %c0_74 = arith.constant 0 : index
    %111 = vector.load %arg3[%c0_73, %c0_74] : memref<1x128xf32, #tpu.memory_space<vmem>>, vector<1x128xf32>
    tpu.vector_store %arg3[%c0_73, %c0_74], %110 {strides = array<i32>} : memref<1x128xf32, #tpu.memory_space<vmem>>, vector<1x128xf32>,
    return
  }
  func.func @transform_0(%arg0: i32) -> (i32, i32) {
    %c0_i32 = arith.constant 0 : i32
    %c0_i32_0 = arith.constant 0 : i32
    return %c0_i32, %arg0 : i32, i32
  }
  func.func @transform_1(%arg0: i32) -> (i32, i32) {
    %c0_i32 = arith.constant 0 : i32
    %c0_i32_0 = arith.constant 0 : i32
    %c0_i32_1 = arith.constant 0 : i32
    return %c0_i32, %c0_i32_0 : i32, i32
  }
  func.func @transform_2(%arg0: i32) -> (i32, i32) {
    %c0_i32 = arith.constant 0 : i32
    %c0_i32_0 = arith.constant 0 : i32
    return %c0_i32, %arg0 : i32, i32
  }
}

module attributes {stable_mosaic.version = 11 : i64} {
  func.func @nbeats_stack_kernel(%arg0: i32, %arg1: memref<16x128xf32, #tpu.memory_space<vmem>>, %arg2: memref<456x33xf32, #tpu.memory_space<vmem>>, %arg3: memref<1x128xf32, #tpu.memory_space<vmem>>) attributes {dimension_semantics = [#tpu.dimension_semantics<parallel>], iteration_bounds = array<i64: 2>, scalar_prefetch = 0 : i64, scratch_operands = 0 : i64, tpu.core_type = #tpu.core_type<tc>, window_params = [{transform_indices = @transform_0, window_bounds = array<i64: 16, 128>}, {pipeline_mode = #tpu.pipeline_mode<synchronous>, transform_indices = @transform_1, window_bounds = array<i64: 456, 33>}, {transform_indices = @transform_2, window_bounds = array<i64: 1, 128>}]} {
    %c0 = arith.constant 0 : index
    %c0_0 = arith.constant 0 : index
    %0 = vector.load %arg1[%c0, %c0_0] : memref<16x128xf32, #tpu.memory_space<vmem>>, vector<16x128xf32>
    %cst = arith.constant 0.000000e+00 : f32
    %1 = vector.broadcast %cst : f32 to vector<1x128xf32>
    %c0_1 = arith.constant 0 : index
    %c0_2 = arith.constant 0 : index
    %2 = vector.load %arg2[%c0_1, %c0_2] : memref<456x33xf32, #tpu.memory_space<vmem>>, vector<32x16xf32>
    %c0_3 = arith.constant 0 : index
    %c16 = arith.constant 16 : index
    %3 = vector.load %arg2[%c0_3, %c16] : memref<456x33xf32, #tpu.memory_space<vmem>>, vector<32x1xf32>
    %cst_4 = arith.constant dense<0.000000e+00> : vector<32x128xf32>
    %4 = tpu.matmul %2, %0, %cst_4 {dimension_numbers = #tpu.dot_dimension_numbers<[1], [0], [0], [1], [0, 0, 1, 1], [], []>} : vector<32x16xf32>, vector<16x128xf32>, vector<32x128xf32> -> vector<32x128xf32>
    %5 = vector.broadcast %3 : vector<32x1xf32> to vector<32x128xf32>
    %6 = arith.addf %4, %5 : vector<32x128xf32>
    %cst_5 = arith.constant 0.000000e+00 : f32
    %7 = vector.broadcast %cst_5 : f32 to vector<32x128xf32>
    %8 = arith.maximumf %6, %7 : vector<32x128xf32>
    %c32 = arith.constant 32 : index
    %c0_6 = arith.constant 0 : index
    %9 = vector.load %arg2[%c32, %c0_6] : memref<456x33xf32, #tpu.memory_space<vmem>>, vector<32x32xf32>
    %c32_7 = arith.constant 32 : index
    %c32_8 = arith.constant 32 : index
    %10 = vector.load %arg2[%c32_7, %c32_8] : memref<456x33xf32, #tpu.memory_space<vmem>>, vector<32x1xf32>
    %cst_9 = arith.constant dense<0.000000e+00> : vector<32x128xf32>
    %11 = tpu.matmul %9, %8, %cst_9 {dimension_numbers = #tpu.dot_dimension_numbers<[1], [0], [0], [1], [0, 0, 1, 1], [], []>} : vector<32x32xf32>, vector<32x128xf32>, vector<32x128xf32> -> vector<32x128xf32>
    %12 = vector.broadcast %10 : vector<32x1xf32> to vector<32x128xf32>
    %13 = arith.addf %11, %12 : vector<32x128xf32>
    %cst_10 = arith.constant 0.000000e+00 : f32
    %14 = vector.broadcast %cst_10 : f32 to vector<32x128xf32>
    %15 = arith.maximumf %13, %14 : vector<32x128xf32>
    %c64 = arith.constant 64 : index
    %c0_11 = arith.constant 0 : index
    %16 = vector.load %arg2[%c64, %c0_11] : memref<456x33xf32, #tpu.memory_space<vmem>>, vector<32x32xf32>
    %c64_12 = arith.constant 64 : index
    %c32_13 = arith.constant 32 : index
    %17 = vector.load %arg2[%c64_12, %c32_13] : memref<456x33xf32, #tpu.memory_space<vmem>>, vector<32x1xf32>
    %cst_14 = arith.constant dense<0.000000e+00> : vector<32x128xf32>
    %18 = tpu.matmul %16, %15, %cst_14 {dimension_numbers = #tpu.dot_dimension_numbers<[1], [0], [0], [1], [0, 0, 1, 1], [], []>} : vector<32x32xf32>, vector<32x128xf32>, vector<32x128xf32> -> vector<32x128xf32>
    %19 = vector.broadcast %17 : vector<32x1xf32> to vector<32x128xf32>
    %20 = arith.addf %18, %19 : vector<32x128xf32>
    %cst_15 = arith.constant 0.000000e+00 : f32
    %21 = vector.broadcast %cst_15 : f32 to vector<32x128xf32>
    %22 = arith.maximumf %20, %21 : vector<32x128xf32>
    %c96 = arith.constant 96 : index
    %c0_16 = arith.constant 0 : index
    %23 = vector.load %arg2[%c96, %c0_16] : memref<456x33xf32, #tpu.memory_space<vmem>>, vector<32x32xf32>
    %c96_17 = arith.constant 96 : index
    %c32_18 = arith.constant 32 : index
    %24 = vector.load %arg2[%c96_17, %c32_18] : memref<456x33xf32, #tpu.memory_space<vmem>>, vector<32x1xf32>
    %cst_19 = arith.constant dense<0.000000e+00> : vector<32x128xf32>
    %25 = tpu.matmul %23, %22, %cst_19 {dimension_numbers = #tpu.dot_dimension_numbers<[1], [0], [0], [1], [0, 0, 1, 1], [], []>} : vector<32x32xf32>, vector<32x128xf32>, vector<32x128xf32> -> vector<32x128xf32>
    %26 = vector.broadcast %24 : vector<32x1xf32> to vector<32x128xf32>
    %27 = arith.addf %25, %26 : vector<32x128xf32>
    %cst_20 = arith.constant 0.000000e+00 : f32
    %28 = vector.broadcast %cst_20 : f32 to vector<32x128xf32>
    %29 = arith.maximumf %27, %28 : vector<32x128xf32>
    %c128 = arith.constant 128 : index
    %c0_21 = arith.constant 0 : index
    %30 = vector.load %arg2[%c128, %c0_21] : memref<456x33xf32, #tpu.memory_space<vmem>>, vector<17x32xf32>
    %c128_22 = arith.constant 128 : index
    %c32_23 = arith.constant 32 : index
    %31 = vector.load %arg2[%c128_22, %c32_23] : memref<456x33xf32, #tpu.memory_space<vmem>>, vector<17x1xf32>
    %cst_24 = arith.constant dense<0.000000e+00> : vector<17x128xf32>
    %32 = tpu.matmul %30, %29, %cst_24 {dimension_numbers = #tpu.dot_dimension_numbers<[1], [0], [0], [1], [0, 0, 1, 1], [], []>} : vector<17x32xf32>, vector<32x128xf32>, vector<17x128xf32> -> vector<17x128xf32>
    %33 = vector.broadcast %31 : vector<17x1xf32> to vector<17x128xf32>
    %34 = arith.addf %32, %33 : vector<17x128xf32>
    %35 = vector.extract_strided_slice %34 {offsets = [0, 0], sizes = [16, 128], strides = [1, 1]} : vector<17x128xf32> to vector<16x128xf32>
    %36 = arith.subf %0, %35 : vector<16x128xf32>
    %37 = vector.extract_strided_slice %34 {offsets = [16, 0], sizes = [1, 128], strides = [1, 1]} : vector<17x128xf32> to vector<1x128xf32>
    %38 = arith.addf %1, %37 : vector<1x128xf32>
    %c152 = arith.constant 152 : index
    %c0_25 = arith.constant 0 : index
    %39 = vector.load %arg2[%c152, %c0_25] : memref<456x33xf32, #tpu.memory_space<vmem>>, vector<32x16xf32>
    %c152_26 = arith.constant 152 : index
    %c16_27 = arith.constant 16 : index
    %40 = vector.load %arg2[%c152_26, %c16_27] : memref<456x33xf32, #tpu.memory_space<vmem>>, vector<32x1xf32>
    %cst_28 = arith.constant dense<0.000000e+00> : vector<32x128xf32>
    %41 = tpu.matmul %39, %36, %cst_28 {dimension_numbers = #tpu.dot_dimension_numbers<[1], [0], [0], [1], [0, 0, 1, 1], [], []>} : vector<32x16xf32>, vector<16x128xf32>, vector<32x128xf32> -> vector<32x128xf32>
    %42 = vector.broadcast %40 : vector<32x1xf32> to vector<32x128xf32>
    %43 = arith.addf %41, %42 : vector<32x128xf32>
    %cst_29 = arith.constant 0.000000e+00 : f32
    %44 = vector.broadcast %cst_29 : f32 to vector<32x128xf32>
    %45 = arith.maximumf %43, %44 : vector<32x128xf32>
    %c184 = arith.constant 184 : index
    %c0_30 = arith.constant 0 : index
    %46 = vector.load %arg2[%c184, %c0_30] : memref<456x33xf32, #tpu.memory_space<vmem>>, vector<32x32xf32>
    %c184_31 = arith.constant 184 : index
    %c32_32 = arith.constant 32 : index
    %47 = vector.load %arg2[%c184_31, %c32_32] : memref<456x33xf32, #tpu.memory_space<vmem>>, vector<32x1xf32>
    %cst_33 = arith.constant dense<0.000000e+00> : vector<32x128xf32>
    %48 = tpu.matmul %46, %45, %cst_33 {dimension_numbers = #tpu.dot_dimension_numbers<[1], [0], [0], [1], [0, 0, 1, 1], [], []>} : vector<32x32xf32>, vector<32x128xf32>, vector<32x128xf32> -> vector<32x128xf32>
    %49 = vector.broadcast %47 : vector<32x1xf32> to vector<32x128xf32>
    %50 = arith.addf %48, %49 : vector<32x128xf32>
    %cst_34 = arith.constant 0.000000e+00 : f32
    %51 = vector.broadcast %cst_34 : f32 to vector<32x128xf32>
    %52 = arith.maximumf %50, %51 : vector<32x128xf32>
    %c216 = arith.constant 216 : index
    %c0_35 = arith.constant 0 : index
    %53 = vector.load %arg2[%c216, %c0_35] : memref<456x33xf32, #tpu.memory_space<vmem>>, vector<32x32xf32>
    %c216_36 = arith.constant 216 : index
    %c32_37 = arith.constant 32 : index
    %54 = vector.load %arg2[%c216_36, %c32_37] : memref<456x33xf32, #tpu.memory_space<vmem>>, vector<32x1xf32>
    %cst_38 = arith.constant dense<0.000000e+00> : vector<32x128xf32>
    %55 = tpu.matmul %53, %52, %cst_38 {dimension_numbers = #tpu.dot_dimension_numbers<[1], [0], [0], [1], [0, 0, 1, 1], [], []>} : vector<32x32xf32>, vector<32x128xf32>, vector<32x128xf32> -> vector<32x128xf32>
    %56 = vector.broadcast %54 : vector<32x1xf32> to vector<32x128xf32>
    %57 = arith.addf %55, %56 : vector<32x128xf32>
    %cst_39 = arith.constant 0.000000e+00 : f32
    %58 = vector.broadcast %cst_39 : f32 to vector<32x128xf32>
    %59 = arith.maximumf %57, %58 : vector<32x128xf32>
    %c248 = arith.constant 248 : index
    %c0_40 = arith.constant 0 : index
    %60 = vector.load %arg2[%c248, %c0_40] : memref<456x33xf32, #tpu.memory_space<vmem>>, vector<32x32xf32>
    %c248_41 = arith.constant 248 : index
    %c32_42 = arith.constant 32 : index
    %61 = vector.load %arg2[%c248_41, %c32_42] : memref<456x33xf32, #tpu.memory_space<vmem>>, vector<32x1xf32>
    %cst_43 = arith.constant dense<0.000000e+00> : vector<32x128xf32>
    %62 = tpu.matmul %60, %59, %cst_43 {dimension_numbers = #tpu.dot_dimension_numbers<[1], [0], [0], [1], [0, 0, 1, 1], [], []>} : vector<32x32xf32>, vector<32x128xf32>, vector<32x128xf32> -> vector<32x128xf32>
    %63 = vector.broadcast %61 : vector<32x1xf32> to vector<32x128xf32>
    %64 = arith.addf %62, %63 : vector<32x128xf32>
    %cst_44 = arith.constant 0.000000e+00 : f32
    %65 = vector.broadcast %cst_44 : f32 to vector<32x128xf32>
    %66 = arith.maximumf %64, %65 : vector<32x128xf32>
    %c280 = arith.constant 280 : index
    %c0_45 = arith.constant 0 : index
    %67 = vector.load %arg2[%c280, %c0_45] : memref<456x33xf32, #tpu.memory_space<vmem>>, vector<17x32xf32>
    %c280_46 = arith.constant 280 : index
    %c32_47 = arith.constant 32 : index
    %68 = vector.load %arg2[%c280_46, %c32_47] : memref<456x33xf32, #tpu.memory_space<vmem>>, vector<17x1xf32>
    %cst_48 = arith.constant dense<0.000000e+00> : vector<17x128xf32>
    %69 = tpu.matmul %67, %66, %cst_48 {dimension_numbers = #tpu.dot_dimension_numbers<[1], [0], [0], [1], [0, 0, 1, 1], [], []>} : vector<17x32xf32>, vector<32x128xf32>, vector<17x128xf32> -> vector<17x128xf32>
    %70 = vector.broadcast %68 : vector<17x1xf32> to vector<17x128xf32>
    %71 = arith.addf %69, %70 : vector<17x128xf32>
    %72 = vector.extract_strided_slice %71 {offsets = [0, 0], sizes = [16, 128], strides = [1, 1]} : vector<17x128xf32> to vector<16x128xf32>
    %73 = arith.subf %36, %72 : vector<16x128xf32>
    %74 = vector.extract_strided_slice %71 {offsets = [16, 0], sizes = [1, 128], strides = [1, 1]} : vector<17x128xf32> to vector<1x128xf32>
    %75 = arith.addf %38, %74 : vector<1x128xf32>
    %c304 = arith.constant 304 : index
    %c0_49 = arith.constant 0 : index
    %76 = vector.load %arg2[%c304, %c0_49] : memref<456x33xf32, #tpu.memory_space<vmem>>, vector<32x16xf32>
    %c304_50 = arith.constant 304 : index
    %c16_51 = arith.constant 16 : index
    %77 = vector.load %arg2[%c304_50, %c16_51] : memref<456x33xf32, #tpu.memory_space<vmem>>, vector<32x1xf32>
    %cst_52 = arith.constant dense<0.000000e+00> : vector<32x128xf32>
    %78 = tpu.matmul %76, %73, %cst_52 {dimension_numbers = #tpu.dot_dimension_numbers<[1], [0], [0], [1], [0, 0, 1, 1], [], []>} : vector<32x16xf32>, vector<16x128xf32>, vector<32x128xf32> -> vector<32x128xf32>
    %79 = vector.broadcast %77 : vector<32x1xf32> to vector<32x128xf32>
    %80 = arith.addf %78, %79 : vector<32x128xf32>
    %cst_53 = arith.constant 0.000000e+00 : f32
    %81 = vector.broadcast %cst_53 : f32 to vector<32x128xf32>
    %82 = arith.maximumf %80, %81 : vector<32x128xf32>
    %c336 = arith.constant 336 : index
    %c0_54 = arith.constant 0 : index
    %83 = vector.load %arg2[%c336, %c0_54] : memref<456x33xf32, #tpu.memory_space<vmem>>, vector<32x32xf32>
    %c336_55 = arith.constant 336 : index
    %c32_56 = arith.constant 32 : index
    %84 = vector.load %arg2[%c336_55, %c32_56] : memref<456x33xf32, #tpu.memory_space<vmem>>, vector<32x1xf32>
    %cst_57 = arith.constant dense<0.000000e+00> : vector<32x128xf32>
    %85 = tpu.matmul %83, %82, %cst_57 {dimension_numbers = #tpu.dot_dimension_numbers<[1], [0], [0], [1], [0, 0, 1, 1], [], []>} : vector<32x32xf32>, vector<32x128xf32>, vector<32x128xf32> -> vector<32x128xf32>
    %86 = vector.broadcast %84 : vector<32x1xf32> to vector<32x128xf32>
    %87 = arith.addf %85, %86 : vector<32x128xf32>
    %cst_58 = arith.constant 0.000000e+00 : f32
    %88 = vector.broadcast %cst_58 : f32 to vector<32x128xf32>
    %89 = arith.maximumf %87, %88 : vector<32x128xf32>
    %c368 = arith.constant 368 : index
    %c0_59 = arith.constant 0 : index
    %90 = vector.load %arg2[%c368, %c0_59] : memref<456x33xf32, #tpu.memory_space<vmem>>, vector<32x32xf32>
    %c368_60 = arith.constant 368 : index
    %c32_61 = arith.constant 32 : index
    %91 = vector.load %arg2[%c368_60, %c32_61] : memref<456x33xf32, #tpu.memory_space<vmem>>, vector<32x1xf32>
    %cst_62 = arith.constant dense<0.000000e+00> : vector<32x128xf32>
    %92 = tpu.matmul %90, %89, %cst_62 {dimension_numbers = #tpu.dot_dimension_numbers<[1], [0], [0], [1], [0, 0, 1, 1], [], []>} : vector<32x32xf32>, vector<32x128xf32>, vector<32x128xf32> -> vector<32x128xf32>
    %93 = vector.broadcast %91 : vector<32x1xf32> to vector<32x128xf32>
    %94 = arith.addf %92, %93 : vector<32x128xf32>
    %cst_63 = arith.constant 0.000000e+00 : f32
    %95 = vector.broadcast %cst_63 : f32 to vector<32x128xf32>
    %96 = arith.maximumf %94, %95 : vector<32x128xf32>
    %c400 = arith.constant 400 : index
    %c0_64 = arith.constant 0 : index
    %97 = vector.load %arg2[%c400, %c0_64] : memref<456x33xf32, #tpu.memory_space<vmem>>, vector<32x32xf32>
    %c400_65 = arith.constant 400 : index
    %c32_66 = arith.constant 32 : index
    %98 = vector.load %arg2[%c400_65, %c32_66] : memref<456x33xf32, #tpu.memory_space<vmem>>, vector<32x1xf32>
    %cst_67 = arith.constant dense<0.000000e+00> : vector<32x128xf32>
    %99 = tpu.matmul %97, %96, %cst_67 {dimension_numbers = #tpu.dot_dimension_numbers<[1], [0], [0], [1], [0, 0, 1, 1], [], []>} : vector<32x32xf32>, vector<32x128xf32>, vector<32x128xf32> -> vector<32x128xf32>
    %100 = vector.broadcast %98 : vector<32x1xf32> to vector<32x128xf32>
    %101 = arith.addf %99, %100 : vector<32x128xf32>
    %cst_68 = arith.constant 0.000000e+00 : f32
    %102 = vector.broadcast %cst_68 : f32 to vector<32x128xf32>
    %103 = arith.maximumf %101, %102 : vector<32x128xf32>
    %c432 = arith.constant 432 : index
    %c0_69 = arith.constant 0 : index
    %104 = vector.load %arg2[%c432, %c0_69] : memref<456x33xf32, #tpu.memory_space<vmem>>, vector<17x32xf32>
    %c432_70 = arith.constant 432 : index
    %c32_71 = arith.constant 32 : index
    %105 = vector.load %arg2[%c432_70, %c32_71] : memref<456x33xf32, #tpu.memory_space<vmem>>, vector<17x1xf32>
    %cst_72 = arith.constant dense<0.000000e+00> : vector<17x128xf32>
    %106 = tpu.matmul %104, %103, %cst_72 {dimension_numbers = #tpu.dot_dimension_numbers<[1], [0], [0], [1], [0, 0, 1, 1], [], []>} : vector<17x32xf32>, vector<32x128xf32>, vector<17x128xf32> -> vector<17x128xf32>
    %107 = vector.broadcast %105 : vector<17x1xf32> to vector<17x128xf32>
    %108 = arith.addf %106, %107 : vector<17x128xf32>
    %109 = vector.extract_strided_slice %108 {offsets = [16, 0], sizes = [1, 128], strides = [1, 1]} : vector<17x128xf32> to vector<1x128xf32>
    %110 = arith.addf %75, %109 : vector<1x128xf32>
    %c0_73 = arith.constant 0 : index
    %c0_74 = arith.constant 0 : index
    %111 = vector.load %arg3[%c0_73, %c0_74] : memref<1x128xf32, #tpu.memory_space<vmem>>, vector<1x128xf32>
    tpu.vector_store %arg3[%c0_73, %c0_74], %110 {strides = array<i32>} : memref<1x128xf32, #tpu.memory_space<vmem>>, vector<1x128xf32>,
    return
  }
  func.func @transform_0(%arg0: i32) -> (i32, i32) {
    %c0_i32 = arith.constant 0 : i32
    %c0_i32_0 = arith.constant 0 : i32
    return %c0_i32, %arg0 : i32, i32
  }
  func.func @transform_1(%arg0: i32) -> (i32, i32) {
    %c0_i32 = arith.constant 0 : i32
    %c0_i32_0 = arith.constant 0 : i32
    %c0_i32_1 = arith.constant 0 : i32
    return %c0_i32, %c0_i32_0 : i32, i32
  }
  func.func @transform_2(%arg0: i32) -> (i32, i32) {
    %c0_i32 = arith.constant 0 : i32
    %c0_i32_0 = arith.constant 0 : i32
    return %c0_i32, %arg0 : i32, i32
  }
}

</mosaic_0001>

<bundles_post_ra>
// kernel: nbeats_stack_forward.1
= control target key start
LH: loop header
LB: loop body
LE: loop exit
PB: predicated region body
PF: predicated region fallthrough
CT: control target
= control target key end

     0   :  { %7 = vsyncpa [#allocation4], 0  ;;  %s1847_s0 = inlined_call_operand.vmem [shape: f32[16,256], index: 0, kind: input, shape index: {}]   ;;  %s1848_s1 = inlined_call_operand.vmem [shape: f32[456,33], index: 1, kind: input, shape index: {}]   ;;  %s1849_s2 = inlined_call_operand.hbm [shape: f32[1,256], index: 2, kind: output, shape index: {}]  }
   0x1   :  { %9 = vsyncpa [#allocation4 + $0x1], 0  ;;  %s1401_s9 = smov 0   ;;  %s1403_s10 = smov 0  }
   0x2   :  { %s1405_s11 = smov 0   ;;  %s1407_s12 = smov 0  }
   0x3 LB: > { %s1191_s13 = sadd.s32 4294967295, %s1382_s12   ;;  %s1192_s14 = sadd.s32 4294967294, %s1382_s12   ;;  %s1382_s12 = sphi %s1407_s12, %s1855_s12   ;;  %s1378_s11 = sphi %s1405_s11, %s1854_s11   ;;  %s1374_s10 = sphi %s1403_s10, %s1853_s10   ;;  %s1370_s9 = sphi %s1401_s9, %s1852_s9  }
   0x4   : > { %s1424_s15 = sadd.s32 1, %s1382_s12   ;;  %s22_s16 = sadd.s32 1, %s1378_s11 }
   0x5   : > { %s19_s17 = ssub.s32 %s1382_s12, %s1424_s15  ;;  %p29_p0 = scmp.ne.s32.totalorder %s1378_s11, %s1374_s10 }
   0x6   : > { %p20_p1 = scmp.eq.s32.totalorder %s19_s17, 0  ;;  %p30_p2 = scmp.eq.s32.totalorder %s1382_s12, 0 }
   0x7   : > { %p80_p3 = scmp.eq.s32.totalorder %s1191_s13, 1  ;;  %p85_p4 = scmp.ne.s32.totalorder %s1374_s10, %s1370_s9 }
   0x8   : > { %s1437_s18 = scalar_select %p20_p1, %s1378_s11, %s22_s16  }
   0x9   : > { %p31_p5 = por %p30_p2, %p29_p0  ;;  %p1439_p6 = por %p80_p3, %p29_p0 }
   0xa   : > { %p86_p7 = scmp.eq.s32.totalorder %s1192_s14, 1  ;;  %p1194_p9 = scmp.ge.s32.totalorder %s1382_s12, 2 }
   0xc   : > { %p1443_p8 = por %p86_p7, %p85_p4  ;;  %105 = sbr.rel (%p1194_p9) target bundleno = 23 (0x17), region = 20 }
  0x11   : > { %108 = sbr.rel (!%p31_p5) target bundleno = 23 (0x17), region = 24  ;;  %s110_s21 = sand.u32 (%p31_p5), 1, %s1378_s11  }
  0x12   : > { %s1196_s22 = sshll.u32 (%p31_p5), %s1382_s12, 3  ;;  %s1195_s23 = sshll.u32 (%p31_p5), %s110_s21, 4 }
  0x13   : > { %s114_s26 = scalar_lea.vmem (%p31_p5), %s1847_s0, %s1196_s22  ;;  %s112_s27 = scalar_lea.vmem (%p31_p5), [#allocation2], %s1195_s23 }
  0x14   : > { %v145_v0 = vld [vmem:[%s114_s26] sm:$0xff] (%p31_p5)  ;;  %v147_v1 = vld [vmem:[%s114_s26 + $0x10] sm:$0xff] (%p31_p5) }
  0x15   : > { %146 = vst [vmem:[%s112_s27] sm:$0xff] (%p31_p5), %v145_v0 }
  0x16   : > { %148 = vst [vmem:[%s112_s27 + $0x8] sm:$0xff] %v147_v1 }
  0x17 PF: > { %p1197_p10 = scmp.ge.s32.totalorder %s1382_s12, 1  ;;  %p153_p11 = scmp.lt.s32.totalorder %s1382_s12, 3 }
  0x19   : > { %p154_p12 = pnand %p1197_p10, %p153_p11 }
  0x1a   : > { %s1458_s28 = sand.u32 (!%p154_p12), 1, %s1374_s10   ;;  %s1127_s17 = scalar_lea.hbm (!%p154_p12), %s1849_s2, %s1191_s13 }
  0x1b   : > { %157 = sbr.rel (%p154_p12) target bundleno = 2441 (0x989), region = 62  ;;  %s1198_s3 = sshll.u32 (!%p154_p12), %s1458_s28, 4 }
  0x1c   : > { %s162_s6 = scalar_lea.vmem (!%p154_p12), [#allocation2], %s1198_s3  ;;  %s179_s21 = scalar_lea.vmem (!%p154_p12), [#allocation3], %s1458_s28 }
  0x1d   : > { %s1129_s22 = sshll.u32 (!%p154_p12), %s179_s21, 4  ;;  %s1131_s23 = sshll.u32 (!%p154_p12), %s1127_s17, 4  ;;  %s1130_s22 = int_to_ptr.vmem [resolvable:$true] %s1129_s22  ;;  %s1132_s23 = int_to_ptr.hbm [resolvable:$true] %s1131_s23 }
  0x1e   : > { %s1119_s24 = scalar_lea.sflag (!%p154_p12), [#allocation4], %s1458_s28  ;;  %s1334_s25 = sshra.s32 (!%p154_p12), %s1132_s23, 4  ;;  %s1335_s25 = int_to_ptr.hbm [resolvable:$true] %s1334_s25 }
  0x1f   : > { %s1336_s26 = scalar_lea.hbm (!%p154_p12), %s1335_s25, 1  ;;  %s1340_s29 = scalar_lea.hbm (!%p154_p12), %s1849_s2, 2 }
  0x20   : > { %v183_v2 = vld [vmem:[%s1848_s1 + $0x8] sm:$0xff]  ;;  %v1384_v3 = vmov 16   ;;  %v185_v4 = vld [vmem:[%s1848_s1 + $0x18] sm:$0xff]  ;;  %v1471_v6 = vld [vmem:[%s162_s6] sm:$0xff]  ;;  %vm206_vm0 = vcmask 130048   ;;  %v1385_v14 = vmov 32   ;;  %p1337_p13 = scmp.ne.s32.totalorder %s1335_s25, %s1336_s26  ;;  %p1341_p2 = scmp.lt.s32.totalorder %s1335_s25, %s1849_s2 }
  0x21   : > { %1304 = vset.pattern.permute.xlu1 %v1384_v3  ;;  %1303 = vset.pattern.permute.xlu0 %v1384_v3  ;;  %v1469_v5 = vld [vmem:[%s162_s6 + $0x8] sm:$0xff]  ;;  %v182_v7 = vld [vmem:[%s1848_s1] sm:$0xff]  ;;  %v184_v8 = vld [vmem:[%s1848_s1 + $0x10] sm:$0xff]  ;;  %vm272_vm1 = vcmask 261120   ;;  %p1342_p3 = scmp.lt.s32.totalorder %s1340_s29, %s1336_s26 }
  0x22   : > { %193 = vperm.xlu1 %1304, %v183_v2   ;;  %203 = vperm.xlu0 %1303, %v185_v4   ;;  %v251_v12 = vld [vmem:[%s1848_s1 + $0x38] sm:$0xff]  ;;  %v248_v13 = vld [vmem:[%s1848_s1 + $0x20] sm:$0xff]  ;;  %v249_v15 = vld [vmem:[%s1848_s1 + $0x28] sm:$0xff]  ;;  %p1338_p0 = pnand %p1337_p13, %p1439_p6 }
  0x23   : > { %229 = vmatpush.msra.mxu0 %v1469_v5  ;;  %1305 = vset.pattern.permute.xlu2 %v1385_v14  ;;  %v250_v18 = vld [vmem:[%s1848_s1 + $0x30] sm:$0xff]  ;;  %v1503_v19 = vld [vmem:[%s1848_s1 + $0x40] sm:$0xff]  ;;  %v317_v28 = vld [vmem:[%s1848_s1 + $0x58] sm:$0xff]  ;;  %p1343_p4 = por %p1342_p3, %p1341_p2 }
  0x24   : > { %269 = vperm.xlu2 %1305, %v251_v12   ;;  %v316_v27 = vld [vmem:[%s1848_s1 + $0x50] sm:$0xff]  ;;  %v1515_v31 = vld [vmem:[%s1848_s1 + $0x68] sm:$0xff]  ;;  %v1521_v34 = vld [vmem:[%s1848_s1 + $0x78] sm:$0xff]  ;;  %p1339_p1 = pneg %p1338_p0 }
  0x25   : > { %230 = vmatpush.msra.mxu0 %v1471_v6  ;;  %v315_v35 = vld [vmem:[%s1848_s1 + $0x48] sm:$0xff]  ;;  %v1531_v36 = vld [vmem:[%s1848_s1 + $0x80] sm:$0xff]  ;;  %v381_v38 = vld [vmem:[%s1848_s1 + $0x70] sm:$0xff] }
  0x26   : > { %1199 = vmatmul.msk.f32.vlgmr.msra.gmra.mxu0 %vm206_vm0, %v182_v7  ;;  %v379_v37 = vld [vmem:[%s1848_s1 + $0x60] sm:$0xff]  ;;  %v1545_v39 = vld [vmem:[%s1848_s1 + $0x88] sm:$0xff]  ;;  %p1344_p5 = pnand %p1343_p4, %p1339_p1 }
  0x2a   : > { %188 = vperm.xlu1 %1304, %v182_v7   ;;  %198 = vperm.xlu0 %1303, %v184_v8  }
  0x2c   : > { %264 = vperm.xlu2 %1305, %v250_v18  }
  0x2e   : > { %1200 = vmatmul.msk.f32.gmra.mxu0 %vm206_vm0, %v183_v2 }
  0x32   : > { %1307 = vset.pattern.permute.xlu1 %v1385_v14  ;;  %1306 = vset.pattern.permute.xlu0 %v1385_v14 }
  0x33   : > { %254 = vperm.xlu1 %1307, %v248_v13   ;;  %259 = vperm.xlu0 %1306, %v249_v15  }
  0x34   : > { %335 = vperm.xlu2 %1305, %v317_v28  }
  0x36   : > { %1201 = vmatmul.msk.f32.gmra.mxu0 %vm206_vm0, %v184_v8 }
  0x3b   : > { %320 = vperm.xlu0 %1306, %v1503_v19   ;;  %330 = vperm.xlu1 %1307, %v316_v27  }
  0x3c   : > { %325 = vperm.xlu2 %1305, %v315_v35  }
  0x3e   : > { %1202 = vmatmul.msk.f32.gmra.mxu0 %vm206_vm0, %v185_v4 }
  0x43   : > { %390 = vperm.xlu0 %1306, %v1515_v31   ;;  %400 = vperm.xlu1 %1307, %v1521_v34  }
  0x44   : > { %395 = vperm.xlu2 %1305, %v381_v38  }
  0x4b   : > { %449 = vperm.xlu0 %1306, %v1531_v36   ;;  %385 = vperm.xlu1 %1307, %v379_v37  }
  0x4c   : > { %454 = vperm.xlu2 %1305, %v1545_v39  }
  0x53   : > { %1310 = vset.pattern.permute.xlu0 %v1384_v3  ;;  %1308 = vset.pattern.permute.xlu1 %v1384_v3 }
  0x54   : > { %1309 = vset.pattern.permute.xlu2 %v1384_v3 }
  0x7e   : > { %v270_v42 = vpop.permute.xlu2 %269 }
  0x86   : > { %v265_v44 = vpop.permute.xlu2 %264 }
  0x8e   : > { %v336_v58 = vpop.permute.xlu2 %335 }
  0x94   : > { %v204_v11 = vpop.permute.xlu0 %203  ;;  %v194_v16 = vpop.permute.xlu1 %193 }
  0x96   : > { %v326_v0 = vpop.permute.xlu2 %325 }
  0x9c   : > { %v199_v20 = vpop.permute.xlu0 %198  ;;  %v189_v24 = vpop.permute.xlu1 %188 }
  0xa3   : > { %v232_v9 = vpop.f32.mrf.mxu0 }
  0xa4   : > { %v233_v29 = vadd.f32 %v232_v9, %v189_v24 }
  0xa5   : > { %v255_v48 = vpop.permute.xlu1 %254  ;;  %v260_v49 = vpop.permute.xlu0 %259 }
  0xa6   : > { %v244_v33 = vmax.f32 %v233_v29, 0.0  ;;  %v498_v29 = vld [vmem:[%s1848_s1 + $0xa0] sm:$0xff] }
  0xa7   : > { %508 = vperm.xlu0 %1310, %v498_v29  }
  0xab   : > { %v235_v10 = vpop.f32.mrf.mxu0 }
  0xac   : > { %v236_v25 = vadd.f32 %v235_v10, %v194_v16  ;;  %v396_v16 = vpop.permute.xlu2 %395 }
  0xad   : > { %v331_v60 = vpop.permute.xlu1 %330  ;;  %v321_v4 = vpop.permute.xlu0 %320 }
  0xae   : > { %v245_v32 = vmax.f32 %v236_v25, 0.0 }
  0xaf   : > { %1313 = vset.pattern.permute.xlu0 %v1385_v14 }
  0xb3   : > { %v238_v17 = vpop.f32.mrf.mxu0 }
  0xb4   : > { %v239_v22 = vadd.f32 %v238_v17, %v199_v20 }
  0xb5   : > { %v391_v20 = vpop.permute.xlu0 %390 }
  0xb6   : > { %v246_v30 = vmax.f32 %v239_v22, 0.0 }
  0xbb   : > { %v241_v21 = vpop.f32.mrf.mxu0 }
  0xbc   : > { %v242_v23 = vadd.f32 %v241_v21, %v204_v11 }
  0xbe   : > { %v247_v26 = vmax.f32 %v242_v23, 0.0 }
  0xc0   : > { %293 = vmatpush.msra.mxu1 %v247_v26 }
  0xc2   : > { %294 = vmatpush.msra.mxu1 %v246_v30  ;;  %v497_v30 = vld [vmem:[%s1848_s1 + $0x98] sm:$0xff] }
  0xc4   : > { %295 = vmatpush.msra.mxu1 %v245_v32 }
  0xc6   : > { %296 = vmatpush.msra.mxu1 %v244_v33  ;;  %v455_v33 = vpop.permute.xlu2 %454 }
  0xc7   : > { %1203 = vmatmul.msk.f32.vlgmr.msra.gmra.mxu1 %vm272_vm1, %v248_v13 }
  0xcf   : > { %1204 = vmatmul.msk.f32.gmra.mxu1 %vm272_vm1, %v249_v15  ;;  %v401_v15 = vpop.permute.xlu1 %400 }
  0xd7   : > { %1205 = vmatmul.msk.f32.gmra.mxu1 %vm272_vm1, %v250_v18  ;;  %v386_v23 = vpop.permute.xlu1 %385 }
  0xdf   : > { %1206 = vmatmul.msk.f32.gmra.mxu1 %vm272_vm1, %v251_v12 }
 0x144   : > { %v298_v40 = vpop.f32.mrf.mxu1 }
 0x145   : > { %v299_v52 = vadd.f32 %v298_v40, %v255_v48 }
 0x147   : > { %v310_v55 = vmax.f32 %v299_v52, 0.0 }
 0x14c   : > { %v301_v41 = vpop.f32.mrf.mxu1 }
 0x14d   : > { %v302_v50 = vadd.f32 %v301_v41, %v260_v49 }
 0x14f   : > { %v311_v54 = vmax.f32 %v302_v50, 0.0 }
 0x154   : > { %v304_v43 = vpop.f32.mrf.mxu1 }
 0x155   : > { %v305_v46 = vadd.f32 %v304_v43, %v265_v44  ;;  %v1603_v44 = vld [vmem:[%s1848_s1 + $0xf0] sm:$0xff] }
 0x157   : > { %v312_v53 = vmax.f32 %v305_v46, 0.0 }
 0x15c   : > { %v307_v45 = vpop.f32.mrf.mxu1 }
 0x15d   : > { %v308_v47 = vadd.f32 %v307_v45, %v270_v42  ;;  %v565_v45 = vld [vmem:[%s1848_s1 + $0xd0] sm:$0xff] }
 0x15f   : > { %v313_v51 = vmax.f32 %v308_v47, 0.0 }
 0x161   : > { %358 = vmatpush.msra.mxu2 %v313_v51 }
 0x163   : > { %359 = vmatpush.msra.mxu2 %v312_v53 }
 0x165   : > { %360 = vmatpush.msra.mxu2 %v311_v54  ;;  %v628_v54 = vld [vmem:[%s1848_s1 + $0xe0] sm:$0xff] }
 0x167   : > { %361 = vmatpush.msra.mxu2 %v310_v55 }
 0x168   : > { %1207 = vmatmul.msk.f32.vlgmr.msra.gmra.mxu2 %vm272_vm1, %v1503_v19 }
 0x170   : > { %1208 = vmatmul.msk.f32.gmra.mxu2 %vm272_vm1, %v315_v35 }
 0x178   : > { %1209 = vmatmul.msk.f32.gmra.mxu2 %vm272_vm1, %v316_v27 }
 0x180   : > { %1210 = vmatmul.msk.f32.gmra.mxu2 %vm272_vm1, %v317_v28  ;;  %v500_v28 = vld [vmem:[%s1848_s1 + $0xb0] sm:$0xff] }
 0x181   : > { %518 = vperm.xlu1 %1308, %v500_v28  }
 0x189   : > { %503 = vperm.xlu1 %1308, %v497_v30  }
 0x191   : > { %1312 = vset.pattern.permute.xlu1 %v1385_v14 }
 0x1eb   : > { %v363_v56 = vpop.f32.mrf.mxu2 }
 0x1ec   : > { %v364_v7 = vadd.f32 %v363_v56, %v321_v4  ;;  %v1659_v4 = vld [vmem:[%s1848_s1 + $0x118] sm:$0xff] }
 0x1ee   : > { %v375_v10 = vmax.f32 %v364_v7, 0.0 }
 0x1f3   : > { %v366_v57 = vpop.f32.mrf.mxu2  ;;  %v519_v42 = vpop.permute.xlu1 %518 }
 0x1f4   : > { %v367_v1 = vadd.f32 %v366_v57, %v326_v0  ;;  %v563_v57 = vld [vmem:[%s1848_s1 + $0xc0] sm:$0xff] }
 0x1f5   : > { %v1640_v0 = vld [vmem:[%s1848_s1 + $0x120] sm:$0xff] }
 0x1f6   : > { %v376_v9 = vmax.f32 %v367_v1, 0.0  ;;  %v627_v1 = vld [vmem:[%s1848_s1 + $0xd8] sm:$0xff] }
 0x1fb   : > { %v369_v59 = vpop.f32.mrf.mxu2  ;;  %v504_v51 = vpop.permute.xlu1 %503 }
 0x1fc   : > { %v370_v62 = vadd.f32 %v369_v59, %v331_v60 }
 0x1fe   : > { %v377_v8 = vmax.f32 %v370_v62, 0.0  ;;  %v629_v62 = vld [vmem:[%s1848_s1 + $0xe8] sm:$0xff] }
 0x203   : > { %v372_v61 = vpop.f32.mrf.mxu2 }
 0x204   : > { %v373_v63 = vadd.f32 %v372_v61, %v336_v58  ;;  %v1618_v58 = vld [vmem:[%s1848_s1 + $0x110] sm:$0xff]  ;;  %v1624_v61 = vld [vmem:[%s1848_s1 + $0x108] sm:$0xff] }
 0x206   : > { %v378_v2 = vmax.f32 %v373_v63, 0.0  ;;  %v1632_v63 = vld [vmem:[%s1848_s1 + $0xf8] sm:$0xff] }
 0x208   : > { %423 = vmatpush.msra.mxu3 %v378_v2  ;;  %v1651_v2 = vld [vmem:[%s1848_s1 + $0x100] sm:$0xff] }
 0x20a   : > { %424 = vmatpush.msra.mxu3 %v377_v8 }
 0x20c   : > { %425 = vmatpush.msra.mxu3 %v376_v9 }
 0x20e   : > { %426 = vmatpush.msra.mxu3 %v375_v10 }
 0x20f   : > { %1211 = vmatmul.msk.f32.vlgmr.msra.gmra.mxu3 %vm272_vm1, %v379_v37 }
 0x217   : > { %1212 = vmatmul.msk.f32.gmra.mxu3 %vm272_vm1, %v1515_v31  ;;  %v499_v31 = vld [vmem:[%s1848_s1 + $0xa8] sm:$0xff] }
 0x218   : > { %513 = vperm.xlu2 %1309, %v499_v31  }
 0x21f   : > { %1213 = vmatmul.msk.f32.gmra.mxu3 %vm272_vm1, %v381_v38 }
 0x220   : > { %1311 = vset.pattern.permute.xlu2 %v1385_v14 }
 0x221   : > { %583 = vperm.xlu2 %1311, %v565_v45  }
 0x227   : > { %1214 = vmatmul.msk.f32.gmra.mxu3 %vm272_vm1, %v1521_v34  ;;  %v450_v34 = vpop.permute.xlu0 %449 }
 0x229   : > { %573 = vperm.xlu2 %1311, %v563_v57  }
 0x22f   : > { %v509_v47 = vpop.permute.xlu0 %508 }
 0x231   : > { %643 = vperm.xlu2 %1311, %v629_v62  }
 0x239   : > { %633 = vperm.xlu2 %1311, %v627_v1  }
 0x241   : > { %703 = vperm.xlu2 %1311, %v1651_v2  }
 0x249   : > { %762 = vperm.xlu2 %1311, %v1659_v4  }
 0x251   : > { %1316 = vset.pattern.permute.xlu2 %v1384_v3 }
 0x272   : > { %v514_v46 = vpop.permute.xlu2 %513 }
 0x27b   : > { %v584_v9 = vpop.permute.xlu2 %583 }
 0x292   : > { %v428_v11 = vpop.f32.mrf.mxu3 }
 0x293   : > { %v429_v24 = vadd.f32 %v428_v11, %v386_v23 }
 0x295   : > { %v440_v27 = vmax.f32 %v429_v24, 0.0  ;;  %v1678_v24 = vld [vmem:[%s1848_s1 + $0x160] sm:$0xff] }
 0x29a   : > { %v431_v12 = vpop.f32.mrf.mxu3 }
 0x29b   : > { %v432_v21 = vadd.f32 %v431_v12, %v391_v20 }
 0x29d   : > { %v441_v26 = vmax.f32 %v432_v21, 0.0 }
 0x2a2   : > { %v434_v13 = vpop.f32.mrf.mxu3 }
 0x2a3   : > { %v435_v18 = vadd.f32 %v434_v13, %v396_v16  ;;  %v574_v16 = vpop.permute.xlu2 %573 }
 0x2a5   : > { %v442_v25 = vmax.f32 %v435_v18, 0.0 }
 0x2aa   : > { %v437_v17 = vpop.f32.mrf.mxu3 }
 0x2ab   : > { %v438_v19 = vadd.f32 %v437_v17, %v401_v15 }
 0x2ad   : > { %v443_v22 = vmax.f32 %v438_v19, 0.0 }
 0x2af   : > { %480 = vmatpush.msrb.mxu0 %v443_v22 }
 0x2b1   : > { %481 = vmatpush.msrb.mxu0 %v442_v25  ;;  %v1685_v25 = vld [vmem:[%s1848_s1 + $0x178] sm:$0xff] }
 0x2b3   : > { %482 = vmatpush.msrb.mxu0 %v441_v26  ;;  %v446_v26 = vld [vmem:[%s1848_s1 + $0x90] sm:$0x1] }
 0x2b5   : > { %483 = vmatpush.msrb.mxu0 %v440_v27  ;;  %v1695_v27 = vld [vmem:[%s1848_s1 + $0x1a0] sm:$0xff] }
 0x2b6   : > { %1215 = vmatmul.msk.f32.vlgmr.msrb.gmra.mxu0 %vm272_vm1, %v1531_v36 }
 0x2be   : > { %1216 = vmatmul.msk.f32.gmra.mxu0 %vm272_vm1, %v1545_v39 }
 0x2c6   : > { %1217 = vmatmul.msk.f32.gmra.mxu0 %vm272_vm1, %v446_v26 }
 0x333   : > { %v485_v32 = vpop.f32.mrf.mxu0 }
 0x334   : > { %v486_v36 = vadd.f32 %v485_v32, %v450_v34  ;;  %v644_v32 = vpop.permute.xlu2 %643 }
 0x336   : > { %v1587_v39 = vsub.f32 %v1471_v6, %v486_v36  ;;  %v564_v6 = vld [vmem:[%s1848_s1 + $0xc8] sm:$0xff] }
 0x337   : > { %578 = vperm.xlu1 %1312, %v564_v6  }
 0x33b   : > { %v488_v35 = vpop.f32.mrf.mxu0 }
 0x33c   : > { %v489_v37 = vadd.f32 %v488_v35, %v455_v33 }
 0x33e   : > { %v1583_v38 = vsub.f32 %v1469_v5, %v489_v37  ;;  %v562_v5 = vld [vmem:[%s1848_s1 + $0xb8] sm:$0xff] }
 0x33f   : > { %568 = vperm.xlu0 %1313, %v562_v5   ;;  %648 = vperm.xlu1 %1312, %v1603_v44  }
 0x340   : > { %543 = vmatpush.msrb.mxu1 %v1583_v38 }
 0x342   : > { %544 = vmatpush.msrb.mxu1 %v1587_v39 }
 0x343   : > { %1218 = vmatmul.msk.f32.vlgmr.msrb.gmra.mxu1 %vm206_vm0, %v497_v30 }
 0x347   : > { %638 = vperm.xlu1 %1312, %v628_v54   ;;  %713 = vperm.xlu0 %1313, %v1618_v58  }
 0x34b   : > { %1219 = vmatmul.msk.f32.gmra.mxu1 %vm206_vm0, %v498_v29 }
 0x34f   : > { %708 = vperm.xlu1 %1312, %v1624_v61   ;;  %698 = vperm.xlu0 %1313, %v1632_v63  }
 0x353   : > { %1220 = vmatmul.msk.f32.gmra.mxu1 %vm206_vm0, %v499_v31 }
 0x357   : > { %767 = vperm.xlu1 %1312, %v1640_v0   ;;  %1314 = vset.pattern.permute.xlu0 %v1384_v3 }
 0x35b   : > { %1221 = vmatmul.msk.f32.gmra.mxu1 %vm206_vm0, %v500_v28 }
 0x35f   : > { %1315 = vset.pattern.permute.xlu1 %v1384_v3  ;;  %v1672_v3 = vld [vmem:[%s1848_s1 + $0x148] sm:$0xff] }
 0x360   : > { %831 = vperm.xlu0 %1314, %v1672_v3  }
 0x368   : > { %1318 = vset.pattern.permute.xlu0 %v1385_v14 }
 0x369   : > { %891 = vperm.xlu0 %1318, %v1678_v24  }
 0x371   : > { %951 = vperm.xlu0 %1318, %v1685_v25  }
 0x379   : > { %1021 = vperm.xlu0 %1318, %v1695_v27  }
 0x381   : > { %459 = vperm.xlu0 %1318, %v446_v26  }
 0x3a9   : > { %v579_v11 = vpop.permute.xlu1 %578 }
 0x3b1   : > { %v569_v17 = vpop.permute.xlu0 %568  ;;  %v649_v30 = vpop.permute.xlu1 %648 }
 0x3b9   : > { %v639_v36 = vpop.permute.xlu1 %638 }
 0x3c0   : > { %v546_v40 = vpop.f32.mrf.mxu1 }
 0x3c1   : > { %v547_v55 = vadd.f32 %v546_v40, %v504_v51  ;;  %v1730_v51 = vld [vmem:[%s1848_s1 + $0x170] sm:$0xff] }
 0x3c3   : > { %v558_v60 = vmax.f32 %v547_v55, 0.0  ;;  %v709_v55 = vpop.permute.xlu1 %708 }
 0x3c8   : > { %v549_v41 = vpop.f32.mrf.mxu1 }
 0x3c9   : > { %v550_v52 = vadd.f32 %v549_v41, %v509_v47  ;;  %v1717_v47 = vld [vmem:[%s1848_s1 + $0x158] sm:$0xff] }
 0x3cb   : > { %v559_v59 = vmax.f32 %v550_v52, 0.0 }
 0x3d0   : > { %v552_v43 = vpop.f32.mrf.mxu1 }
 0x3d1   : > { %v553_v49 = vadd.f32 %v552_v43, %v514_v46  ;;  %v1712_v46 = vpop.f32.mrf.mxu0 }
 0x3d3   : > { %v560_v56 = vmax.f32 %v553_v49, 0.0  ;;  %v1724_v49 = vld [vmem:[%s1848_s1 + $0x188] sm:$0xff] }
 0x3d8   : > { %v555_v48 = vpop.f32.mrf.mxu1 }
 0x3d9   : > { %v556_v50 = vadd.f32 %v555_v48, %v519_v42 }
 0x3db   : > { %v561_v53 = vmax.f32 %v556_v50, 0.0 }
 0x3dd   : > { %606 = vmatpush.msrb.mxu2 %v561_v53  ;;  %v714_v53 = vpop.permute.xlu0 %713 }
 0x3df   : > { %607 = vmatpush.msrb.mxu2 %v560_v56 }
 0x3e1   : > { %608 = vmatpush.msrb.mxu2 %v559_v59 }
 0x3e3   : > { %609 = vmatpush.msrb.mxu2 %v558_v60 }
 0x3e4   : > { %1222 = vmatmul.msk.f32.vlgmr.msrb.gmra.mxu2 %vm272_vm1, %v562_v5  ;;  %v634_v5 = vpop.permute.xlu2 %633 }
 0x3ec   : > { %1223 = vmatmul.msk.f32.gmra.mxu2 %vm272_vm1, %v563_v57  ;;  %v704_v59 = vpop.permute.xlu2 %703 }
 0x3f4   : > { %1224 = vmatmul.msk.f32.gmra.mxu2 %vm272_vm1, %v564_v6 }
 0x3fc   : > { %1225 = vmatmul.msk.f32.gmra.mxu2 %vm272_vm1, %v565_v45  ;;  %v810_v45 = vld [vmem:[%s1848_s1 + $0x130] sm:$0xff] }
 0x467   : > { %v611_v7 = vpop.f32.mrf.mxu2 }
 0x468   : > { %v612_v20 = vadd.f32 %v611_v7, %v569_v17 }
 0x46a   : > { %v623_v23 = vmax.f32 %v612_v20, 0.0 }
 0x46f   : > { %v614_v8 = vpop.f32.mrf.mxu2 }
 0x470   : > { %v615_v18 = vadd.f32 %v614_v8, %v574_v16 }
 0x472   : > { %v624_v22 = vmax.f32 %v615_v18, 0.0 }
 0x477   : > { %v617_v10 = vpop.f32.mrf.mxu2 }
 0x478   : > { %v618_v13 = vadd.f32 %v617_v10, %v579_v11  ;;  %v763_v11 = vpop.permute.xlu2 %762 }
 0x47a   : > { %v625_v21 = vmax.f32 %v618_v13, 0.0 }
 0x47f   : > { %v620_v12 = vpop.f32.mrf.mxu2 }
 0x480   : > { %v621_v15 = vadd.f32 %v620_v12, %v584_v9  ;;  %v811_v9 = vld [vmem:[%s1848_s1 + $0x138] sm:$0xff]  ;;  %v768_v12 = vpop.permute.xlu1 %767 }
 0x481   : > { %821 = vperm.xlu2 %1316, %v811_v9  }
 0x482   : > { %v626_v19 = vmax.f32 %v621_v15, 0.0 }
 0x484   : > { %671 = vmatpush.msrb.mxu3 %v626_v19 }
 0x486   : > { %672 = vmatpush.msrb.mxu3 %v625_v21 }
 0x488   : > { %673 = vmatpush.msrb.mxu3 %v624_v22 }
 0x489   : > { %1317 = vset.pattern.permute.xlu2 %v1385_v14 }
 0x48a   : > { %674 = vmatpush.msrb.mxu3 %v623_v23 }
 0x48b   : > { %1226 = vmatmul.msk.f32.vlgmr.msrb.gmra.mxu3 %vm272_vm1, %v627_v1 }
 0x493   : > { %1227 = vmatmul.msk.f32.gmra.mxu3 %vm272_vm1, %v628_v54  ;;  %v1736_v54 = vld [vmem:[%s1848_s1 + $0x198] sm:$0xff] }
 0x49b   : > { %1228 = vmatmul.msk.f32.gmra.mxu3 %vm272_vm1, %v629_v62  ;;  %v699_v62 = vpop.permute.xlu0 %698 }
 0x4a3   : > { %1229 = vmatmul.msk.f32.gmra.mxu3 %vm272_vm1, %v1603_v44  ;;  %v812_v44 = vld [vmem:[%s1848_s1 + $0x140] sm:$0xff] }
 0x4a4   : > { %826 = vperm.xlu1 %1315, %v812_v44  }
 0x4ac   : > { %816 = vperm.xlu1 %1315, %v810_v45  }
 0x4b4   : > { %1319 = vset.pattern.permute.xlu1 %v1385_v14 }
 0x4b5   : > { %886 = vperm.xlu1 %1319, %v1717_v47  }
 0x4bd   : > { %961 = vperm.xlu1 %1319, %v1724_v49  }
 0x4c5   : > { %946 = vperm.xlu1 %1319, %v1730_v51  }
 0x4cd   : > { %1016 = vperm.xlu1 %1319, %v1736_v54  }
 0x4db   : > { %v822_v20 = vpop.permute.xlu2 %821 }
 0x50e   : > { %v676_v28 = vpop.f32.mrf.mxu3 }
 0x50f   : > { %v677_v41 = vadd.f32 %v676_v28, %v634_v5 }
 0x511   : > { %v688_v43 = vmax.f32 %v677_v41, 0.0 }
 0x516   : > { %v679_v29 = vpop.f32.mrf.mxu3  ;;  %v827_v19 = vpop.permute.xlu1 %826 }
 0x517   : > { %v680_v37 = vadd.f32 %v679_v29, %v639_v36  ;;  %v1005_v36 = vld [vmem:[%s1848_s1 + $0x190] sm:$0xff] }
 0x519   : > { %v689_v42 = vmax.f32 %v680_v37, 0.0  ;;  %v1781_v37 = vld [vmem:[%s1848_s1 + $0x1c0] sm:$0x1] }
 0x51e   : > { %v682_v31 = vpop.f32.mrf.mxu3  ;;  %v817_v29 = vpop.permute.xlu1 %816 }
 0x51f   : > { %v683_v34 = vadd.f32 %v682_v31, %v644_v32 }
 0x521   : > { %v690_v6 = vmax.f32 %v683_v34, 0.0  ;;  %v942_v34 = vld [vmem:[%s1848_s1 + $0x180] sm:$0xff] }
 0x526   : > { %v685_v33 = vpop.f32.mrf.mxu3 }
 0x527   : > { %v686_v35 = vadd.f32 %v685_v33, %v649_v30 }
 0x529   : > { %v691_v40 = vmax.f32 %v686_v35, 0.0  ;;  %v1008_v35 = vld [vmem:[%s1848_s1 + $0x1a8] sm:$0xff] }
 0x52b   : > { %736 = vmatpush.msra.mxu0 %v691_v40 }
 0x52d   : > { %737 = vmatpush.msra.mxu0 %v690_v6 }
 0x52f   : > { %738 = vmatpush.msra.mxu0 %v689_v42 }
 0x531   : > { %739 = vmatpush.msra.mxu0 %v688_v43 }
 0x532   : > { %1230 = vmatmul.msk.f32.vlgmr.msra.gmra.mxu0 %vm272_vm1, %v1632_v63 }
 0x53a   : > { %1231 = vmatmul.msk.f32.gmra.mxu0 %vm272_vm1, %v1651_v2  ;;  %v759_v2 = vld [vmem:[%s1848_s1 + $0x128] sm:$0x1] }
 0x53b   : > { %772 = vperm.xlu1 %1319, %v759_v2  }
 0x542   : > { %1232 = vmatmul.msk.f32.gmra.mxu0 %vm272_vm1, %v1624_v61 }
 0x54a   : > { %1233 = vmatmul.msk.f32.gmra.mxu0 %vm272_vm1, %v1618_v58 }
 0x5af   : > { %v741_v48 = vpop.f32.mrf.mxu0 }
 0x5b0   : > { %v742_v63 = vadd.f32 %v741_v48, %v699_v62 }
 0x5b2   : > { %v753_v8 = vmax.f32 %v742_v63, 0.0 }
 0x5b7   : > { %v744_v50 = vpop.f32.mrf.mxu0 }
 0x5b8   : > { %v745_v60 = vadd.f32 %v744_v50, %v704_v59 }
 0x5ba   : > { %v754_v7 = vmax.f32 %v745_v60, 0.0 }
 0x5bf   : > { %v747_v52 = vpop.f32.mrf.mxu0 }
 0x5c0   : > { %v748_v57 = vadd.f32 %v747_v52, %v709_v55 }
 0x5c2   : > { %v755_v1 = vmax.f32 %v748_v57, 0.0 }
 0x5c7   : > { %v750_v56 = vpop.f32.mrf.mxu0 }
 0x5c8   : > { %v751_v58 = vadd.f32 %v750_v56, %v714_v53 }
 0x5ca   : > { %v756_v61 = vmax.f32 %v751_v58, 0.0 }
 0x5cc   : > { %793 = vmatpush.msra.mxu1 %v756_v61  ;;  %1258 = vmatpush.msra.mxu3 %v756_v61 }
 0x5ce   : > { %794 = vmatpush.msra.mxu1 %v755_v1  ;;  %1259 = vmatpush.msra.mxu3 %v755_v1 }
 0x5d0   : > { %795 = vmatpush.msra.mxu1 %v754_v7  ;;  %1260 = vmatpush.msra.mxu3 %v754_v7 }
 0x5d2   : > { %796 = vmatpush.msra.mxu1 %v753_v8  ;;  %1261 = vmatpush.msra.mxu3 %v753_v8 }
 0x5d3   : > { %1234 = vmatmul.msk.f32.vlgmr.msra.gmra.mxu1 %vm272_vm1, %v1659_v4  ;;  %1235 = vmatmul.msk.f32.vlgmr.msra.gmra.mxu3 %vm272_vm1, %v1640_v0 }
 0x5db   : > { %1236 = vmatmul.msk.f32.gmra.mxu3 %vm272_vm1, %v759_v2 }
 0x650   : > { %v798_v10 = vpop.f32.mrf.mxu1 }
 0x651   : > { %v799_v15 = vadd.f32 %v798_v10, %v763_v11 }
 0x653   : > { %v807_v17 = vsub.f32 %v1587_v39, %v799_v15  ;;  %v832_v39 = vpop.permute.xlu0 %831 }
 0x656   : > { %v801_v13 = vpop.f32.mrf.mxu3 }
 0x657   : > { %v802_v16 = vadd.f32 %v801_v13, %v768_v12 }
 0x659   : > { %v808_v4 = vsub.f32 %v1583_v38, %v802_v16  ;;  %v878_v38 = vld [vmem:[%s1848_s1 + $0x168] sm:$0xff] }
 0x65a   : > { %896 = vperm.xlu2 %1317, %v878_v38  }
 0x65b   : > { %856 = vmatpush.msra.mxu2 %v808_v4  ;;  %v892_v43 = vpop.permute.xlu0 %891 }
 0x65d   : > { %857 = vmatpush.msra.mxu2 %v807_v17 }
 0x65e   : > { %1237 = vmatmul.msk.f32.vlgmr.msra.gmra.mxu2 %vm206_vm0, %v810_v45  ;;  %v1785_v40 = vpop.f32.mrf.mxu3 }
 0x663   : > { %v952_v7 = vpop.permute.xlu0 %951 }
 0x666   : > { %1238 = vmatmul.msk.f32.gmra.mxu2 %vm206_vm0, %v811_v9 }
 0x66b   : > { %v1022_v4 = vpop.permute.xlu0 %1021 }
 0x66e   : > { %1239 = vmatmul.msk.f32.gmra.mxu2 %vm206_vm0, %v812_v44 }
 0x676   : > { %1240 = vmatmul.msk.f32.gmra.mxu2 %vm206_vm0, %v1672_v3  ;;  %v875_v3 = vld [vmem:[%s1848_s1 + $0x150] sm:$0xff] }
 0x677   : > { %881 = vperm.xlu2 %1317, %v875_v3  }
 0x67f   : > { %956 = vperm.xlu2 %1317, %v942_v34  }
 0x687   : > { %1026 = vperm.xlu2 %1317, %v1008_v35  }
 0x68f   : > { %1011 = vperm.xlu2 %1317, %v1005_v36  }
 0x697   : > { %1083 = vperm.xlu2 %1317, %v1781_v37  }
 0x6b4   : > { %v897_v42 = vpop.permute.xlu2 %896 }
 0x6d1   : > { %v882_v52 = vpop.permute.xlu2 %881 }
 0x6d9   : > { %v957_v62 = vpop.permute.xlu2 %956 }
 0x6e1   : > { %v859_v14 = vpop.f32.mrf.mxu2  ;;  %v1027_v16 = vpop.permute.xlu2 %1026 }
 0x6e2   : > { %v860_v30 = vadd.f32 %v859_v14, %v817_v29 }
 0x6e4   : > { %v871_v33 = vmax.f32 %v860_v30, 0.0 }
 0x6e9   : > { %v862_v0 = vpop.f32.mrf.mxu2 }
 0x6ea   : > { %v863_v26 = vadd.f32 %v862_v0, %v822_v20 }
 0x6ec   : > { %v872_v32 = vmax.f32 %v863_v26, 0.0 }
 0x6f1   : > { %v865_v18 = vpop.f32.mrf.mxu2 }
 0x6f2   : > { %v866_v22 = vadd.f32 %v865_v18, %v827_v19 }
 0x6f4   : > { %v873_v31 = vmax.f32 %v866_v22, 0.0  ;;  %v1070_v22 = vld [vmem:[%s1848_s1 + $0x1b0] sm:$0xff] }
 0x6f9   : > { %v868_v21 = vpop.f32.mrf.mxu2 }
 0x6fa   : > { %v869_v23 = vadd.f32 %v868_v21, %v832_v39  ;;  %v1012_v39 = vpop.permute.xlu2 %1011 }
 0x6fc   : > { %v874_v28 = vmax.f32 %v869_v23, 0.0  ;;  %v1071_v23 = vld [vmem:[%s1848_s1 + $0x1b8] sm:$0xff] }
 0x6fe   : > { %919 = vmatpush.msrb.mxu3 %v874_v28 }
 0x700   : > { %920 = vmatpush.msrb.mxu3 %v873_v31 }
 0x702   : > { %921 = vmatpush.msrb.mxu3 %v872_v32  ;;  %v1084_v32 = vpop.permute.xlu2 %1083 }
 0x704   : > { %922 = vmatpush.msrb.mxu3 %v871_v33 }
 0x705   : > { %1241 = vmatmul.msk.f32.vlgmr.msrb.gmra.mxu3 %vm272_vm1, %v875_v3  ;;  %v460_v3 = vpop.permute.xlu0 %459 }
 0x706   : > { %v492_v31 = vadd.f32 %v1712_v46, %v460_v3 }
 0x70d   : > { %1242 = vmatmul.msk.f32.gmra.mxu3 %vm272_vm1, %v1717_v47  ;;  %v887_v47 = vpop.permute.xlu1 %886 }
 0x715   : > { %1243 = vmatmul.msk.f32.gmra.mxu3 %vm272_vm1, %v1678_v24  ;;  %v962_v61 = vpop.permute.xlu1 %961 }
 0x71d   : > { %1244 = vmatmul.msk.f32.gmra.mxu3 %vm272_vm1, %v878_v38 }
 0x788   : > { %v924_v5 = vpop.f32.mrf.mxu3 }
 0x789   : > { %v925_v53 = vadd.f32 %v924_v5, %v882_v52 }
 0x78b   : > { %v936_v57 = vmax.f32 %v925_v53, 0.0 }
 0x790   : > { %v927_v41 = vpop.f32.mrf.mxu3 }
 0x791   : > { %v928_v48 = vadd.f32 %v927_v41, %v887_v47 }
 0x793   : > { %v937_v56 = vmax.f32 %v928_v48, 0.0 }
 0x798   : > { %v930_v6 = vpop.f32.mrf.mxu3 }
 0x799   : > { %v931_v45 = vadd.f32 %v930_v6, %v892_v43 }
 0x79b   : > { %v938_v55 = vmax.f32 %v931_v45, 0.0 }
 0x7a0   : > { %v933_v44 = vpop.f32.mrf.mxu3 }
 0x7a1   : > { %v934_v24 = vadd.f32 %v933_v44, %v897_v42 }
 0x7a3   : > { %v939_v50 = vmax.f32 %v934_v24, 0.0 }
 0x7a5   : > { %984 = vmatpush.msrb.mxu0 %v939_v50 }
 0x7a7   : > { %985 = vmatpush.msrb.mxu0 %v938_v55 }
 0x7a9   : > { %986 = vmatpush.msrb.mxu0 %v937_v56 }
 0x7ab   : > { %987 = vmatpush.msrb.mxu0 %v936_v57 }
 0x7ac   : > { %1245 = vmatmul.msk.f32.vlgmr.msrb.gmra.mxu0 %vm272_vm1, %v1730_v51  ;;  %v947_v51 = vpop.permute.xlu1 %946 }
 0x7b4   : > { %1246 = vmatmul.msk.f32.gmra.mxu0 %vm272_vm1, %v1685_v25  ;;  %v1017_v18 = vpop.permute.xlu1 %1016 }
 0x7bc   : > { %1247 = vmatmul.msk.f32.gmra.mxu0 %vm272_vm1, %v942_v34  ;;  %v773_v29 = vpop.permute.xlu1 %772 }
 0x7bd   : > { %v805_v30 = vadd.f32 %v1785_v40, %v773_v29 }
 0x7bf   : > { %v809_v34 = vadd.f32 %v805_v30, %v492_v31 }
 0x7c4   : > { %1248 = vmatmul.msk.f32.gmra.mxu0 %vm272_vm1, %v1724_v49 }
 0x829   : > { %v989_v58 = vpop.f32.mrf.mxu0 }
 0x82a   : > { %v990_v10 = vadd.f32 %v989_v58, %v947_v51 }
 0x82c   : > { %v1001_v12 = vmax.f32 %v990_v10, 0.0 }
 0x831   : > { %v992_v59 = vpop.f32.mrf.mxu0 }
 0x832   : > { %v993_v8 = vadd.f32 %v992_v59, %v952_v7 }
 0x834   : > { %v1002_v25 = vmax.f32 %v993_v8, 0.0 }
 0x839   : > { %v995_v60 = vpop.f32.mrf.mxu0 }
 0x83a   : > { %v996_v1 = vadd.f32 %v995_v60, %v957_v62 }
 0x83c   : > { %v1003_v11 = vmax.f32 %v996_v1, 0.0 }
 0x841   : > { %v998_v63 = vpop.f32.mrf.mxu0 }
 0x842   : > { %v999_v2 = vadd.f32 %v998_v63, %v962_v61 }
 0x844   : > { %v1004_v9 = vmax.f32 %v999_v2, 0.0 }
 0x846   : > { %1049 = vmatpush.msrb.mxu1 %v1004_v9 }
 0x848   : > { %1050 = vmatpush.msrb.mxu1 %v1003_v11 }
 0x84a   : > { %1051 = vmatpush.msrb.mxu1 %v1002_v25 }
 0x84c   : > { %1052 = vmatpush.msrb.mxu1 %v1001_v12 }
 0x84d   : > { %1249 = vmatmul.msk.f32.vlgmr.msrb.gmra.mxu1 %vm272_vm1, %v1005_v36 }
 0x855   : > { %1250 = vmatmul.msk.f32.gmra.mxu1 %vm272_vm1, %v1736_v54 }
 0x85d   : > { %1251 = vmatmul.msk.f32.gmra.mxu1 %vm272_vm1, %v1695_v27 }
 0x865   : > { %1252 = vmatmul.msk.f32.gmra.mxu1 %vm272_vm1, %v1008_v35 }
 0x8ca   : > { %v1054_v49 = vpop.f32.mrf.mxu1 }
 0x8cb   : > { %v1055_v20 = vadd.f32 %v1054_v49, %v1012_v39 }
 0x8cd   : > { %v1066_v27 = vmax.f32 %v1055_v20, 0.0 }
 0x8d2   : > { %v1057_v13 = vpop.f32.mrf.mxu1 }
 0x8d3   : > { %v1058_v19 = vadd.f32 %v1057_v13, %v1017_v18 }
 0x8d5   : > { %v1067_v54 = vmax.f32 %v1058_v19, 0.0 }
 0x8da   : > { %v1060_v15 = vpop.f32.mrf.mxu1 }
 0x8db   : > { %v1061_v14 = vadd.f32 %v1060_v15, %v1022_v4 }
 0x8dd   : > { %v1068_v21 = vmax.f32 %v1061_v14, 0.0 }
 0x8e2   : > { %v1063_v17 = vpop.f32.mrf.mxu1 }
 0x8e3   : > { %v1064_v0 = vadd.f32 %v1063_v17, %v1027_v16 }
 0x8e5   : > { %v1069_v38 = vmax.f32 %v1064_v0, 0.0 }
 0x8e7   : > { %1104 = vmatpush.msrb.mxu2 %v1069_v38 }
 0x8e9   : > { %1105 = vmatpush.msrb.mxu2 %v1068_v21 }
 0x8eb   : > { %1106 = vmatpush.msrb.mxu2 %v1067_v54 }
 0x8ed   : > { %1107 = vmatpush.msrb.mxu2 %v1066_v27 }
 0x8ee   : > { %1253 = vmatmul.msk.f32.vlgmr.msrb.gmra.mxu2 %vm272_vm1, %v1070_v22 }
 0x8f6   : > { %1254 = vmatmul.msk.f32.gmra.mxu2 %vm272_vm1, %v1071_v23 }
 0x8fe   : > { %1255 = vmatmul.msk.f32.gmra.mxu2 %vm272_vm1, %v1781_v37 }
 0x971   : > { %v1109_v26 = vpop.f32.mrf.mxu2 }
 0x979   : > { %v1111_v28 = vpop.f32.mrf.mxu2 }
 0x981   : > { %v1113_v33 = vpop.f32.mrf.mxu2 }
 0x982   : > { %v1114_v35 = vadd.f32 %v1113_v33, %v1084_v32 }
 0x984   : > { %v1116_v36 = vadd.f32 %v1114_v35, %v809_v34 }
 0x986   : > { %1117 = vst [vmem:[%s179_s21] sm:$0x1] %v1116_v36 }
 0x987   : > { %1347 = shalt.err (!%p1344_p5)
}
 0x988   : > { %1262 = dma.vmem_to_hbm [thread:$0]  (%p1439_p6), %s1130_s22, 16, %s1132_s23, %s1119_s24  }
 0x989 PF: > { %s1143_s28 = sand.u32 1, %s1370_s9   ;;  %p1265_p7 = pnand %p1194_p9, %p1443_p8 }
 0x98a   : > { %s1144_s4 = scalar_lea.sflag [#allocation4], %s1143_s28 }
 0x98b   : > { %p1266_p10 = pneg %p1265_p7 }
 0x98d   : > { %1365 = dma.done.wait (%p1266_p10), %s1144_s4, 16  }
 0x98e   : > { %1367 = vsyncadd (%p1266_p10), %s1144_s4, 4294967280  ;;  %p12_p11 = scmp.ge.s32.totalorder %s1424_s15, 4   ;;  %s1852_s9 = smov %s1374_s10 }
 0x98f   : > { %s1853_s10 = smov %s1378_s11  ;;  %s1854_s11 = smov %s1437_s18 }
 0x990   : > { %s1855_s12 = smov %s1424_s15  ;;  %14 = sbr.rel (!%p12_p11) target bundleno = 3 (0x3), region = 106 }
 0x995   :  { %1149 = vsyncpa [#allocation4], 1 }
 0x996   :  { %1151 = vsyncpa [#allocation4 + $0x1], 1 }

// kernel: nbeats_stack_forward.1
= control target key start
LH: loop header
LB: loop body
LE: loop exit
PB: predicated region body
PF: predicated region fallthrough
CT: control target
= control target key end

     0   :  { %7 = vsyncpa [#allocation4], 0  ;;  %s1847_s0 = inlined_call_operand.vmem [shape: f32[16,256], index: 0, kind: input, shape index: {}]   ;;  %s1848_s1 = inlined_call_operand.vmem [shape: f32[456,33], index: 1, kind: input, shape index: {}]   ;;  %s1849_s2 = inlined_call_operand.hbm [shape: f32[1,256], index: 2, kind: output, shape index: {}]  }
   0x1   :  { %9 = vsyncpa [#allocation4 + $0x1], 0  ;;  %s1401_s9 = smov 0   ;;  %s1403_s10 = smov 0  }
   0x2   :  { %s1405_s11 = smov 0   ;;  %s1407_s12 = smov 0  }
   0x3 LB: > { %s1191_s13 = sadd.s32 4294967295, %s1382_s12   ;;  %s1192_s14 = sadd.s32 4294967294, %s1382_s12   ;;  %s1382_s12 = sphi %s1407_s12, %s1855_s12   ;;  %s1378_s11 = sphi %s1405_s11, %s1854_s11   ;;  %s1374_s10 = sphi %s1403_s10, %s1853_s10   ;;  %s1370_s9 = sphi %s1401_s9, %s1852_s9  }
   0x4   : > { %s1424_s15 = sadd.s32 1, %s1382_s12   ;;  %s22_s16 = sadd.s32 1, %s1378_s11 }
   0x5   : > { %s19_s17 = ssub.s32 %s1382_s12, %s1424_s15  ;;  %p29_p0 = scmp.ne.s32.totalorder %s1378_s11, %s1374_s10 }
   0x6   : > { %p20_p1 = scmp.eq.s32.totalorder %s19_s17, 0  ;;  %p30_p2 = scmp.eq.s32.totalorder %s1382_s12, 0 }
   0x7   : > { %p80_p3 = scmp.eq.s32.totalorder %s1191_s13, 1  ;;  %p85_p4 = scmp.ne.s32.totalorder %s1374_s10, %s1370_s9 }
   0x8   : > { %s1437_s18 = scalar_select %p20_p1, %s1378_s11, %s22_s16  }
   0x9   : > { %p31_p5 = por %p30_p2, %p29_p0  ;;  %p1439_p6 = por %p80_p3, %p29_p0 }
   0xa   : > { %p86_p7 = scmp.eq.s32.totalorder %s1192_s14, 1  ;;  %p1194_p9 = scmp.ge.s32.totalorder %s1382_s12, 2 }
   0xc   : > { %p1443_p8 = por %p86_p7, %p85_p4  ;;  %105 = sbr.rel (%p1194_p9) target bundleno = 23 (0x17), region = 20 }
  0x11   : > { %108 = sbr.rel (!%p31_p5) target bundleno = 23 (0x17), region = 24  ;;  %s110_s21 = sand.u32 (%p31_p5), 1, %s1378_s11  }
  0x12   : > { %s1196_s22 = sshll.u32 (%p31_p5), %s1382_s12, 3  ;;  %s1195_s23 = sshll.u32 (%p31_p5), %s110_s21, 4 }
  0x13   : > { %s114_s26 = scalar_lea.vmem (%p31_p5), %s1847_s0, %s1196_s22  ;;  %s112_s27 = scalar_lea.vmem (%p31_p5), [#allocation2], %s1195_s23 }
  0x14   : > { %v145_v0 = vld [vmem:[%s114_s26] sm:$0xff] (%p31_p5)  ;;  %v147_v1 = vld [vmem:[%s114_s26 + $0x10] sm:$0xff] (%p31_p5) }
  0x15   : > { %146 = vst [vmem:[%s112_s27] sm:$0xff] (%p31_p5), %v145_v0 }
  0x16   : > { %148 = vst [vmem:[%s112_s27 + $0x8] sm:$0xff] %v147_v1 }
  0x17 PF: > { %p1197_p10 = scmp.ge.s32.totalorder %s1382_s12, 1  ;;  %p153_p11 = scmp.lt.s32.totalorder %s1382_s12, 3 }
  0x19   : > { %p154_p12 = pnand %p1197_p10, %p153_p11 }
  0x1a   : > { %s1458_s28 = sand.u32 (!%p154_p12), 1, %s1374_s10   ;;  %s1127_s17 = scalar_lea.hbm (!%p154_p12), %s1849_s2, %s1191_s13 }
  0x1b   : > { %157 = sbr.rel (%p154_p12) target bundleno = 2441 (0x989), region = 62  ;;  %s1198_s3 = sshll.u32 (!%p154_p12), %s1458_s28, 4 }
  0x1c   : > { %s162_s6 = scalar_lea.vmem (!%p154_p12), [#allocation2], %s1198_s3  ;;  %s179_s21 = scalar_lea.vmem (!%p154_p12), [#allocation3], %s1458_s28 }
  0x1d   : > { %s1129_s22 = sshll.u32 (!%p154_p12), %s179_s21, 4  ;;  %s1131_s23 = sshll.u32 (!%p154_p12), %s1127_s17, 4  ;;  %s1130_s22 = int_to_ptr.vmem [resolvable:$true] %s1129_s22  ;;  %s1132_s23 = int_to_ptr.hbm [resolvable:$true] %s1131_s23 }
  0x1e   : > { %s1119_s24 = scalar_lea.sflag (!%p154_p12), [#allocation4], %s1458_s28  ;;  %s1334_s25 = sshra.s32 (!%p154_p12), %s1132_s23, 4  ;;  %s1335_s25 = int_to_ptr.hbm [resolvable:$true] %s1334_s25 }
  0x1f   : > { %s1336_s26 = scalar_lea.hbm (!%p154_p12), %s1335_s25, 1  ;;  %s1340_s29 = scalar_lea.hbm (!%p154_p12), %s1849_s2, 2 }
  0x20   : > { %v183_v2 = vld [vmem:[%s1848_s1 + $0x8] sm:$0xff]  ;;  %v1384_v3 = vmov 16   ;;  %v185_v4 = vld [vmem:[%s1848_s1 + $0x18] sm:$0xff]  ;;  %v1471_v6 = vld [vmem:[%s162_s6] sm:$0xff]  ;;  %vm206_vm0 = vcmask 130048   ;;  %v1385_v14 = vmov 32   ;;  %p1337_p13 = scmp.ne.s32.totalorder %s1335_s25, %s1336_s26  ;;  %p1341_p2 = scmp.lt.s32.totalorder %s1335_s25, %s1849_s2 }
  0x21   : > { %1304 = vset.pattern.permute.xlu1 %v1384_v3  ;;  %1303 = vset.pattern.permute.xlu0 %v1384_v3  ;;  %v1469_v5 = vld [vmem:[%s162_s6 + $0x8] sm:$0xff]  ;;  %v182_v7 = vld [vmem:[%s1848_s1] sm:$0xff]  ;;  %v184_v8 = vld [vmem:[%s1848_s1 + $0x10] sm:$0xff]  ;;  %vm272_vm1 = vcmask 261120   ;;  %p1342_p3 = scmp.lt.s32.totalorder %s1340_s29, %s1336_s26 }
  0x22   : > { %193 = vperm.xlu1 %1304, %v183_v2   ;;  %203 = vperm.xlu0 %1303, %v185_v4   ;;  %v251_v12 = vld [vmem:[%s1848_s1 + $0x38] sm:$0xff]  ;;  %v248_v13 = vld [vmem:[%s1848_s1 + $0x20] sm:$0xff]  ;;  %v249_v15 = vld [vmem:[%s1848_s1 + $0x28] sm:$0xff]  ;;  %p1338_p0 = pnand %p1337_p13, %p1439_p6 }
  0x23   : > { %229 = vmatpush.msra.mxu0 %v1469_v5  ;;  %1305 = vset.pattern.permute.xlu2 %v1385_v14  ;;  %v250_v18 = vld [vmem:[%s1848_s1 + $0x30] sm:$0xff]  ;;  %v1503_v19 = vld [vmem:[%s1848_s1 + $0x40] sm:$0xff]  ;;  %v317_v28 = vld [vmem:[%s1848_s1 + $0x58] sm:$0xff]  ;;  %p1343_p4 = por %p1342_p3, %p1341_p2 }
  0x24   : > { %269 = vperm.xlu2 %1305, %v251_v12   ;;  %v316_v27 = vld [vmem:[%s1848_s1 + $0x50] sm:$0xff]  ;;  %v1515_v31 = vld [vmem:[%s1848_s1 + $0x68] sm:$0xff]  ;;  %v1521_v34 = vld [vmem:[%s1848_s1 + $0x78] sm:$0xff]  ;;  %p1339_p1 = pneg %p1338_p0 }
  0x25   : > { %230 = vmatpush.msra.mxu0 %v1471_v6  ;;  %v315_v35 = vld [vmem:[%s1848_s1 + $0x48] sm:$0xff]  ;;  %v1531_v36 = vld [vmem:[%s1848_s1 + $0x80] sm:$0xff]  ;;  %v381_v38 = vld [vmem:[%s1848_s1 + $0x70] sm:$0xff] }
  0x26   : > { %1199 = vmatmul.msk.f32.vlgmr.msra.gmra.mxu0 %vm206_vm0, %v182_v7  ;;  %v379_v37 = vld [vmem:[%s1848_s1 + $0x60] sm:$0xff]  ;;  %v1545_v39 = vld [vmem:[%s1848_s1 + $0x88] sm:$0xff]  ;;  %p1344_p5 = pnand %p1343_p4, %p1339_p1 }
  0x2a   : > { %188 = vperm.xlu1 %1304, %v182_v7   ;;  %198 = vperm.xlu0 %1303, %v184_v8  }
  0x2c   : > { %264 = vperm.xlu2 %1305, %v250_v18  }
  0x2e   : > { %1200 = vmatmul.msk.f32.gmra.mxu0 %vm206_vm0, %v183_v2 }
  0x32   : > { %1307 = vset.pattern.permute.xlu1 %v1385_v14  ;;  %1306 = vset.pattern.permute.xlu0 %v1385_v14 }
  0x33   : > { %254 = vperm.xlu1 %1307, %v248_v13   ;;  %259 = vperm.xlu0 %1306, %v249_v15  }
  0x34   : > { %335 = vperm.xlu2 %1305, %v317_v28  }
  0x36   : > { %1201 = vmatmul.msk.f32.gmra.mxu0 %vm206_vm0, %v184_v8 }
  0x3b   : > { %320 = vperm.xlu0 %1306, %v1503_v19   ;;  %330 = vperm.xlu1 %1307, %v316_v27  }
  0x3c   : > { %325 = vperm.xlu2 %1305, %v315_v35  }
  0x3e   : > { %1202 = vmatmul.msk.f32.gmra.mxu0 %vm206_vm0, %v185_v4 }
  0x43   : > { %390 = vperm.xlu0 %1306, %v1515_v31   ;;  %400 = vperm.xlu1 %1307, %v1521_v34  }
  0x44   : > { %395 = vperm.xlu2 %1305, %v381_v38  }
  0x4b   : > { %449 = vperm.xlu0 %1306, %v1531_v36   ;;  %385 = vperm.xlu1 %1307, %v379_v37  }
  0x4c   : > { %454 = vperm.xlu2 %1305, %v1545_v39  }
  0x53   : > { %1310 = vset.pattern.permute.xlu0 %v1384_v3  ;;  %1308 = vset.pattern.permute.xlu1 %v1384_v3 }
  0x54   : > { %1309 = vset.pattern.permute.xlu2 %v1384_v3 }
  0x7e   : > { %v270_v42 = vpop.permute.xlu2 %269 }
  0x86   : > { %v265_v44 = vpop.permute.xlu2 %264 }
  0x8e   : > { %v336_v58 = vpop.permute.xlu2 %335 }
  0x94   : > { %v204_v11 = vpop.permute.xlu0 %203  ;;  %v194_v16 = vpop.permute.xlu1 %193 }
  0x96   : > { %v326_v0 = vpop.permute.xlu2 %325 }
  0x9c   : > { %v199_v20 = vpop.permute.xlu0 %198  ;;  %v189_v24 = vpop.permute.xlu1 %188 }
  0xa3   : > { %v232_v9 = vpop.f32.mrf.mxu0 }
  0xa4   : > { %v233_v29 = vadd.f32 %v232_v9, %v189_v24 }
  0xa5   : > { %v255_v48 = vpop.permute.xlu1 %254  ;;  %v260_v49 = vpop.permute.xlu0 %259 }
  0xa6   : > { %v244_v33 = vmax.f32 %v233_v29, 0.0  ;;  %v498_v29 = vld [vmem:[%s1848_s1 + $0xa0] sm:$0xff] }
  0xa7   : > { %508 = vperm.xlu0 %1310, %v498_v29  }
  0xab   : > { %v235_v10 = vpop.f32.mrf.mxu0 }
  0xac   : > { %v236_v25 = vadd.f32 %v235_v10, %v194_v16  ;;  %v396_v16 = vpop.permute.xlu2 %395 }
  0xad   : > { %v331_v60 = vpop.permute.xlu1 %330  ;;  %v321_v4 = vpop.permute.xlu0 %320 }
  0xae   : > { %v245_v32 = vmax.f32 %v236_v25, 0.0 }
  0xaf   : > { %1313 = vset.pattern.permute.xlu0 %v1385_v14 }
  0xb3   : > { %v238_v17 = vpop.f32.mrf.mxu0 }
  0xb4   : > { %v239_v22 = vadd.f32 %v238_v17, %v199_v20 }
  0xb5   : > { %v391_v20 = vpop.permute.xlu0 %390 }
  0xb6   : > { %v246_v30 = vmax.f32 %v239_v22, 0.0 }
  0xbb   : > { %v241_v21 = vpop.f32.mrf.mxu0 }
  0xbc   : > { %v242_v23 = vadd.f32 %v241_v21, %v204_v11 }
  0xbe   : > { %v247_v26 = vmax.f32 %v242_v23, 0.0 }
  0xc0   : > { %293 = vmatpush.msra.mxu1 %v247_v26 }
  0xc2   : > { %294 = vmatpush.msra.mxu1 %v246_v30  ;;  %v497_v30 = vld [vmem:[%s1848_s1 + $0x98] sm:$0xff] }
  0xc4   : > { %295 = vmatpush.msra.mxu1 %v245_v32 }
  0xc6   : > { %296 = vmatpush.msra.mxu1 %v244_v33  ;;  %v455_v33 = vpop.permute.xlu2 %454 }
  0xc7   : > { %1203 = vmatmul.msk.f32.vlgmr.msra.gmra.mxu1 %vm272_vm1, %v248_v13 }
  0xcf   : > { %1204 = vmatmul.msk.f32.gmra.mxu1 %vm272_vm1, %v249_v15  ;;  %v401_v15 = vpop.permute.xlu1 %400 }
  0xd7   : > { %1205 = vmatmul.msk.f32.gmra.mxu1 %vm272_vm1, %v250_v18  ;;  %v386_v23 = vpop.permute.xlu1 %385 }
  0xdf   : > { %1206 = vmatmul.msk.f32.gmra.mxu1 %vm272_vm1, %v251_v12 }
 0x144   : > { %v298_v40 = vpop.f32.mrf.mxu1 }
 0x145   : > { %v299_v52 = vadd.f32 %v298_v40, %v255_v48 }
 0x147   : > { %v310_v55 = vmax.f32 %v299_v52, 0.0 }
 0x14c   : > { %v301_v41 = vpop.f32.mrf.mxu1 }
 0x14d   : > { %v302_v50 = vadd.f32 %v301_v41, %v260_v49 }
 0x14f   : > { %v311_v54 = vmax.f32 %v302_v50, 0.0 }
 0x154   : > { %v304_v43 = vpop.f32.mrf.mxu1 }
 0x155   : > { %v305_v46 = vadd.f32 %v304_v43, %v265_v44  ;;  %v1603_v44 = vld [vmem:[%s1848_s1 + $0xf0] sm:$0xff] }
 0x157   : > { %v312_v53 = vmax.f32 %v305_v46, 0.0 }
 0x15c   : > { %v307_v45 = vpop.f32.mrf.mxu1 }
 0x15d   : > { %v308_v47 = vadd.f32 %v307_v45, %v270_v42  ;;  %v565_v45 = vld [vmem:[%s1848_s1 + $0xd0] sm:$0xff] }
 0x15f   : > { %v313_v51 = vmax.f32 %v308_v47, 0.0 }
 0x161   : > { %358 = vmatpush.msra.mxu2 %v313_v51 }
 0x163   : > { %359 = vmatpush.msra.mxu2 %v312_v53 }
 0x165   : > { %360 = vmatpush.msra.mxu2 %v311_v54  ;;  %v628_v54 = vld [vmem:[%s1848_s1 + $0xe0] sm:$0xff] }
 0x167   : > { %361 = vmatpush.msra.mxu2 %v310_v55 }
 0x168   : > { %1207 = vmatmul.msk.f32.vlgmr.msra.gmra.mxu2 %vm272_vm1, %v1503_v19 }
 0x170   : > { %1208 = vmatmul.msk.f32.gmra.mxu2 %vm272_vm1, %v315_v35 }
 0x178   : > { %1209 = vmatmul.msk.f32.gmra.mxu2 %vm272_vm1, %v316_v27 }
 0x180   : > { %1210 = vmatmul.msk.f32.gmra.mxu2 %vm272_vm1, %v317_v28  ;;  %v500_v28 = vld [vmem:[%s1848_s1 + $0xb0] sm:$0xff] }
 0x181   : > { %518 = vperm.xlu1 %1308, %v500_v28  }
 0x189   : > { %503 = vperm.xlu1 %1308, %v497_v30  }
 0x191   : > { %1312 = vset.pattern.permute.xlu1 %v1385_v14 }
 0x1eb   : > { %v363_v56 = vpop.f32.mrf.mxu2 }
 0x1ec   : > { %v364_v7 = vadd.f32 %v363_v56, %v321_v4  ;;  %v1659_v4 = vld [vmem:[%s1848_s1 + $0x118] sm:$0xff] }
 0x1ee   : > { %v375_v10 = vmax.f32 %v364_v7, 0.0 }
 0x1f3   : > { %v366_v57 = vpop.f32.mrf.mxu2  ;;  %v519_v42 = vpop.permute.xlu1 %518 }
 0x1f4   : > { %v367_v1 = vadd.f32 %v366_v57, %v326_v0  ;;  %v563_v57 = vld [vmem:[%s1848_s1 + $0xc0] sm:$0xff] }
 0x1f5   : > { %v1640_v0 = vld [vmem:[%s1848_s1 + $0x120] sm:$0xff] }
 0x1f6   : > { %v376_v9 = vmax.f32 %v367_v1, 0.0  ;;  %v627_v1 = vld [vmem:[%s1848_s1 + $0xd8] sm:$0xff] }
 0x1fb   : > { %v369_v59 = vpop.f32.mrf.mxu2  ;;  %v504_v51 = vpop.permute.xlu1 %503 }
 0x1fc   : > { %v370_v62 = vadd.f32 %v369_v59, %v331_v60 }
 0x1fe   : > { %v377_v8 = vmax.f32 %v370_v62, 0.0  ;;  %v629_v62 = vld [vmem:[%s1848_s1 + $0xe8] sm:$0xff] }
 0x203   : > { %v372_v61 = vpop.f32.mrf.mxu2 }
 0x204   : > { %v373_v63 = vadd.f32 %v372_v61, %v336_v58  ;;  %v1618_v58 = vld [vmem:[%s1848_s1 + $0x110] sm:$0xff]  ;;  %v1624_v61 = vld [vmem:[%s1848_s1 + $0x108] sm:$0xff] }
 0x206   : > { %v378_v2 = vmax.f32 %v373_v63, 0.0  ;;  %v1632_v63 = vld [vmem:[%s1848_s1 + $0xf8] sm:$0xff] }
 0x208   : > { %423 = vmatpush.msra.mxu3 %v378_v2  ;;  %v1651_v2 = vld [vmem:[%s1848_s1 + $0x100] sm:$0xff] }
 0x20a   : > { %424 = vmatpush.msra.mxu3 %v377_v8 }
 0x20c   : > { %425 = vmatpush.msra.mxu3 %v376_v9 }
 0x20e   : > { %426 = vmatpush.msra.mxu3 %v375_v10 }
 0x20f   : > { %1211 = vmatmul.msk.f32.vlgmr.msra.gmra.mxu3 %vm272_vm1, %v379_v37 }
 0x217   : > { %1212 = vmatmul.msk.f32.gmra.mxu3 %vm272_vm1, %v1515_v31  ;;  %v499_v31 = vld [vmem:[%s1848_s1 + $0xa8] sm:$0xff] }
 0x218   : > { %513 = vperm.xlu2 %1309, %v499_v31  }
 0x21f   : > { %1213 = vmatmul.msk.f32.gmra.mxu3 %vm272_vm1, %v381_v38 }
 0x220   : > { %1311 = vset.pattern.permute.xlu2 %v1385_v14 }
 0x221   : > { %583 = vperm.xlu2 %1311, %v565_v45  }
 0x227   : > { %1214 = vmatmul.msk.f32.gmra.mxu3 %vm272_vm1, %v1521_v34  ;;  %v450_v34 = vpop.permute.xlu0 %449 }
 0x229   : > { %573 = vperm.xlu2 %1311, %v563_v57  }
 0x22f   : > { %v509_v47 = vpop.permute.xlu0 %508 }
 0x231   : > { %643 = vperm.xlu2 %1311, %v629_v62  }
 0x239   : > { %633 = vperm.xlu2 %1311, %v627_v1  }
 0x241   : > { %703 = vperm.xlu2 %1311, %v1651_v2  }
 0x249   : > { %762 = vperm.xlu2 %1311, %v1659_v4  }
 0x251   : > { %1316 = vset.pattern.permute.xlu2 %v1384_v3 }
 0x272   : > { %v514_v46 = vpop.permute.xlu2 %513 }
 0x27b   : > { %v584_v9 = vpop.permute.xlu2 %583 }
 0x292   : > { %v428_v11 = vpop.f32.mrf.mxu3 }
 0x293   : > { %v429_v24 = vadd.f32 %v428_v11, %v386_v23 }
 0x295   : > { %v440_v27 = vmax.f32 %v429_v24, 0.0  ;;  %v1678_v24 = vld [vmem:[%s1848_s1 + $0x160] sm:$0xff] }
 0x29a   : > { %v431_v12 = vpop.f32.mrf.mxu3 }
 0x29b   : > { %v432_v21 = vadd.f32 %v431_v12, %v391_v20 }
 0x29d   : > { %v441_v26 = vmax.f32 %v432_v21, 0.0 }
 0x2a2   : > { %v434_v13 = vpop.f32.mrf.mxu3 }
 0x2a3   : > { %v435_v18 = vadd.f32 %v434_v13, %v396_v16  ;;  %v574_v16 = vpop.permute.xlu2 %573 }
 0x2a5   : > { %v442_v25 = vmax.f32 %v435_v18, 0.0 }
 0x2aa   : > { %v437_v17 = vpop.f32.mrf.mxu3 }
 0x2ab   : > { %v438_v19 = vadd.f32 %v437_v17, %v401_v15 }
 0x2ad   : > { %v443_v22 = vmax.f32 %v438_v19, 0.0 }
 0x2af   : > { %480 = vmatpush.msrb.mxu0 %v443_v22 }
 0x2b1   : > { %481 = vmatpush.msrb.mxu0 %v442_v25  ;;  %v1685_v25 = vld [vmem:[%s1848_s1 + $0x178] sm:$0xff] }
 0x2b3   : > { %482 = vmatpush.msrb.mxu0 %v441_v26  ;;  %v446_v26 = vld [vmem:[%s1848_s1 + $0x90] sm:$0x1] }
 0x2b5   : > { %483 = vmatpush.msrb.mxu0 %v440_v27  ;;  %v1695_v27 = vld [vmem:[%s1848_s1 + $0x1a0] sm:$0xff] }
 0x2b6   : > { %1215 = vmatmul.msk.f32.vlgmr.msrb.gmra.mxu0 %vm272_vm1, %v1531_v36 }
 0x2be   : > { %1216 = vmatmul.msk.f32.gmra.mxu0 %vm272_vm1, %v1545_v39 }
 0x2c6   : > { %1217 = vmatmul.msk.f32.gmra.mxu0 %vm272_vm1, %v446_v26 }
 0x333   : > { %v485_v32 = vpop.f32.mrf.mxu0 }
 0x334   : > { %v486_v36 = vadd.f32 %v485_v32, %v450_v34  ;;  %v644_v32 = vpop.permute.xlu2 %643 }
 0x336   : > { %v1587_v39 = vsub.f32 %v1471_v6, %v486_v36  ;;  %v564_v6 = vld [vmem:[%s1848_s1 + $0xc8] sm:$0xff] }
 0x337   : > { %578 = vperm.xlu1 %1312, %v564_v6  }
 0x33b   : > { %v488_v35 = vpop.f32.mrf.mxu0 }
 0x33c   : > { %v489_v37 = vadd.f32 %v488_v35, %v455_v33 }
 0x33e   : > { %v1583_v38 = vsub.f32 %v1469_v5, %v489_v37  ;;  %v562_v5 = vld [vmem:[%s1848_s1 + $0xb8] sm:$0xff] }
 0x33f   : > { %568 = vperm.xlu0 %1313, %v562_v5   ;;  %648 = vperm.xlu1 %1312, %v1603_v44  }
 0x340   : > { %543 = vmatpush.msrb.mxu1 %v1583_v38 }
 0x342   : > { %544 = vmatpush.msrb.mxu1 %v1587_v39 }
 0x343   : > { %1218 = vmatmul.msk.f32.vlgmr.msrb.gmra.mxu1 %vm206_vm0, %v497_v30 }
 0x347   : > { %638 = vperm.xlu1 %1312, %v628_v54   ;;  %713 = vperm.xlu0 %1313, %v1618_v58  }
 0x34b   : > { %1219 = vmatmul.msk.f32.gmra.mxu1 %vm206_vm0, %v498_v29 }
 0x34f   : > { %708 = vperm.xlu1 %1312, %v1624_v61   ;;  %698 = vperm.xlu0 %1313, %v1632_v63  }
 0x353   : > { %1220 = vmatmul.msk.f32.gmra.mxu1 %vm206_vm0, %v499_v31 }
 0x357   : > { %767 = vperm.xlu1 %1312, %v1640_v0   ;;  %1314 = vset.pattern.permute.xlu0 %v1384_v3 }
 0x35b   : > { %1221 = vmatmul.msk.f32.gmra.mxu1 %vm206_vm0, %v500_v28 }
 0x35f   : > { %1315 = vset.pattern.permute.xlu1 %v1384_v3  ;;  %v1672_v3 = vld [vmem:[%s1848_s1 + $0x148] sm:$0xff] }
 0x360   : > { %831 = vperm.xlu0 %1314, %v1672_v3  }
 0x368   : > { %1318 = vset.pattern.permute.xlu0 %v1385_v14 }
 0x369   : > { %891 = vperm.xlu0 %1318, %v1678_v24  }
 0x371   : > { %951 = vperm.xlu0 %1318, %v1685_v25  }
 0x379   : > { %1021 = vperm.xlu0 %1318, %v1695_v27  }
 0x381   : > { %459 = vperm.xlu0 %1318, %v446_v26  }
 0x3a9   : > { %v579_v11 = vpop.permute.xlu1 %578 }
 0x3b1   : > { %v569_v17 = vpop.permute.xlu0 %568  ;;  %v649_v30 = vpop.permute.xlu1 %648 }
 0x3b9   : > { %v639_v36 = vpop.permute.xlu1 %638 }
 0x3c0   : > { %v546_v40 = vpop.f32.mrf.mxu1 }
 0x3c1   : > { %v547_v55 = vadd.f32 %v546_v40, %v504_v51  ;;  %v1730_v51 = vld [vmem:[%s1848_s1 + $0x170] sm:$0xff] }
 0x3c3   : > { %v558_v60 = vmax.f32 %v547_v55, 0.0  ;;  %v709_v55 = vpop.permute.xlu1 %708 }
 0x3c8   : > { %v549_v41 = vpop.f32.mrf.mxu1 }
 0x3c9   : > { %v550_v52 = vadd.f32 %v549_v41, %v509_v47  ;;  %v1717_v47 = vld [vmem:[%s1848_s1 + $0x158] sm:$0xff] }
 0x3cb   : > { %v559_v59 = vmax.f32 %v550_v52, 0.0 }
 0x3d0   : > { %v552_v43 = vpop.f32.mrf.mxu1 }
 0x3d1   : > { %v553_v49 = vadd.f32 %v552_v43, %v514_v46  ;;  %v1712_v46 = vpop.f32.mrf.mxu0 }
 0x3d3   : > { %v560_v56 = vmax.f32 %v553_v49, 0.0  ;;  %v1724_v49 = vld [vmem:[%s1848_s1 + $0x188] sm:$0xff] }
 0x3d8   : > { %v555_v48 = vpop.f32.mrf.mxu1 }
 0x3d9   : > { %v556_v50 = vadd.f32 %v555_v48, %v519_v42 }
 0x3db   : > { %v561_v53 = vmax.f32 %v556_v50, 0.0 }
 0x3dd   : > { %606 = vmatpush.msrb.mxu2 %v561_v53  ;;  %v714_v53 = vpop.permute.xlu0 %713 }
 0x3df   : > { %607 = vmatpush.msrb.mxu2 %v560_v56 }
 0x3e1   : > { %608 = vmatpush.msrb.mxu2 %v559_v59 }
 0x3e3   : > { %609 = vmatpush.msrb.mxu2 %v558_v60 }
 0x3e4   : > { %1222 = vmatmul.msk.f32.vlgmr.msrb.gmra.mxu2 %vm272_vm1, %v562_v5  ;;  %v634_v5 = vpop.permute.xlu2 %633 }
 0x3ec   : > { %1223 = vmatmul.msk.f32.gmra.mxu2 %vm272_vm1, %v563_v57  ;;  %v704_v59 = vpop.permute.xlu2 %703 }
 0x3f4   : > { %1224 = vmatmul.msk.f32.gmra.mxu2 %vm272_vm1, %v564_v6 }
 0x3fc   : > { %1225 = vmatmul.msk.f32.gmra.mxu2 %vm272_vm1, %v565_v45  ;;  %v810_v45 = vld [vmem:[%s1848_s1 + $0x130] sm:$0xff] }
 0x467   : > { %v611_v7 = vpop.f32.mrf.mxu2 }
 0x468   : > { %v612_v20 = vadd.f32 %v611_v7, %v569_v17 }
 0x46a   : > { %v623_v23 = vmax.f32 %v612_v20, 0.0 }
 0x46f   : > { %v614_v8 = vpop.f32.mrf.mxu2 }
 0x470   : > { %v615_v18 = vadd.f32 %v614_v8, %v574_v16 }
 0x472   : > { %v624_v22 = vmax.f32 %v615_v18, 0.0 }
 0x477   : > { %v617_v10 = vpop.f32.mrf.mxu2 }
 0x478   : > { %v618_v13 = vadd.f32 %v617_v10, %v579_v11  ;;  %v763_v11 = vpop.permute.xlu2 %762 }
 0x47a   : > { %v625_v21 = vmax.f32 %v618_v13, 0.0 }
 0x47f   : > { %v620_v12 = vpop.f32.mrf.mxu2 }
 0x480   : > { %v621_v15 = vadd.f32 %v620_v12, %v584_v9  ;;  %v811_v9 = vld [vmem:[%s1848_s1 + $0x138] sm:$0xff]  ;;  %v768_v12 = vpop.permute.xlu1 %767 }
 0x481   : > { %821 = vperm.xlu2 %1316, %v811_v9  }
 0x482   : > { %v626_v19 = vmax.f32 %v621_v15, 0.0 }
 0x484   : > { %671 = vmatpush.msrb.mxu3 %v626_v19 }
 0x486   : > { %672 = vmatpush.msrb.mxu3 %v625_v21 }
 0x488   : > { %673 = vmatpush.msrb.mxu3 %v624_v22 }
 0x489   : > { %1317 = vset.pattern.permute.xlu2 %v1385_v14 }
 0x48a   : > { %674 = vmatpush.msrb.mxu3 %v623_v23 }
 0x48b   : > { %1226 = vmatmul.msk.f32.vlgmr.msrb.gmra.mxu3 %vm272_vm1, %v627_v1 }
 0x493   : > { %1227 = vmatmul.msk.f32.gmra.mxu3 %vm272_vm1, %v628_v54  ;;  %v1736_v54 = vld [vmem:[%s1848_s1 + $0x198] sm:$0xff] }
 0x49b   : > { %1228 = vmatmul.msk.f32.gmra.mxu3 %vm272_vm1, %v629_v62  ;;  %v699_v62 = vpop.permute.xlu0 %698 }
 0x4a3   : > { %1229 = vmatmul.msk.f32.gmra.mxu3 %vm272_vm1, %v1603_v44  ;;  %v812_v44 = vld [vmem:[%s1848_s1 + $0x140] sm:$0xff] }
 0x4a4   : > { %826 = vperm.xlu1 %1315, %v812_v44  }
 0x4ac   : > { %816 = vperm.xlu1 %1315, %v810_v45  }
 0x4b4   : > { %1319 = vset.pattern.permute.xlu1 %v1385_v14 }
 0x4b5   : > { %886 = vperm.xlu1 %1319, %v1717_v47  }
 0x4bd   : > { %961 = vperm.xlu1 %1319, %v1724_v49  }
 0x4c5   : > { %946 = vperm.xlu1 %1319, %v1730_v51  }
 0x4cd   : > { %1016 = vperm.xlu1 %1319, %v1736_v54  }
 0x4db   : > { %v822_v20 = vpop.permute.xlu2 %821 }
 0x50e   : > { %v676_v28 = vpop.f32.mrf.mxu3 }
 0x50f   : > { %v677_v41 = vadd.f32 %v676_v28, %v634_v5 }
 0x511   : > { %v688_v43 = vmax.f32 %v677_v41, 0.0 }
 0x516   : > { %v679_v29 = vpop.f32.mrf.mxu3  ;;  %v827_v19 = vpop.permute.xlu1 %826 }
 0x517   : > { %v680_v37 = vadd.f32 %v679_v29, %v639_v36  ;;  %v1005_v36 = vld [vmem:[%s1848_s1 + $0x190] sm:$0xff] }
 0x519   : > { %v689_v42 = vmax.f32 %v680_v37, 0.0  ;;  %v1781_v37 = vld [vmem:[%s1848_s1 + $0x1c0] sm:$0x1] }
 0x51e   : > { %v682_v31 = vpop.f32.mrf.mxu3  ;;  %v817_v29 = vpop.permute.xlu1 %816 }
 0x51f   : > { %v683_v34 = vadd.f32 %v682_v31, %v644_v32 }
 0x521   : > { %v690_v6 = vmax.f32 %v683_v34, 0.0  ;;  %v942_v34 = vld [vmem:[%s1848_s1 + $0x180] sm:$0xff] }
 0x526   : > { %v685_v33 = vpop.f32.mrf.mxu3 }
 0x527   : > { %v686_v35 = vadd.f32 %v685_v33, %v649_v30 }
 0x529   : > { %v691_v40 = vmax.f32 %v686_v35, 0.0  ;;  %v1008_v35 = vld [vmem:[%s1848_s1 + $0x1a8] sm:$0xff] }
 0x52b   : > { %736 = vmatpush.msra.mxu0 %v691_v40 }
 0x52d   : > { %737 = vmatpush.msra.mxu0 %v690_v6 }
 0x52f   : > { %738 = vmatpush.msra.mxu0 %v689_v42 }
 0x531   : > { %739 = vmatpush.msra.mxu0 %v688_v43 }
 0x532   : > { %1230 = vmatmul.msk.f32.vlgmr.msra.gmra.mxu0 %vm272_vm1, %v1632_v63 }
 0x53a   : > { %1231 = vmatmul.msk.f32.gmra.mxu0 %vm272_vm1, %v1651_v2  ;;  %v759_v2 = vld [vmem:[%s1848_s1 + $0x128] sm:$0x1] }
 0x53b   : > { %772 = vperm.xlu1 %1319, %v759_v2  }
 0x542   : > { %1232 = vmatmul.msk.f32.gmra.mxu0 %vm272_vm1, %v1624_v61 }
 0x54a   : > { %1233 = vmatmul.msk.f32.gmra.mxu0 %vm272_vm1, %v1618_v58 }
 0x5af   : > { %v741_v48 = vpop.f32.mrf.mxu0 }
 0x5b0   : > { %v742_v63 = vadd.f32 %v741_v48, %v699_v62 }
 0x5b2   : > { %v753_v8 = vmax.f32 %v742_v63, 0.0 }
 0x5b7   : > { %v744_v50 = vpop.f32.mrf.mxu0 }
 0x5b8   : > { %v745_v60 = vadd.f32 %v744_v50, %v704_v59 }
 0x5ba   : > { %v754_v7 = vmax.f32 %v745_v60, 0.0 }
 0x5bf   : > { %v747_v52 = vpop.f32.mrf.mxu0 }
 0x5c0   : > { %v748_v57 = vadd.f32 %v747_v52, %v709_v55 }
 0x5c2   : > { %v755_v1 = vmax.f32 %v748_v57, 0.0 }
 0x5c7   : > { %v750_v56 = vpop.f32.mrf.mxu0 }
 0x5c8   : > { %v751_v58 = vadd.f32 %v750_v56, %v714_v53 }
 0x5ca   : > { %v756_v61 = vmax.f32 %v751_v58, 0.0 }
 0x5cc   : > { %793 = vmatpush.msra.mxu1 %v756_v61  ;;  %1258 = vmatpush.msra.mxu3 %v756_v61 }
 0x5ce   : > { %794 = vmatpush.msra.mxu1 %v755_v1  ;;  %1259 = vmatpush.msra.mxu3 %v755_v1 }
 0x5d0   : > { %795 = vmatpush.msra.mxu1 %v754_v7  ;;  %1260 = vmatpush.msra.mxu3 %v754_v7 }
 0x5d2   : > { %796 = vmatpush.msra.mxu1 %v753_v8  ;;  %1261 = vmatpush.msra.mxu3 %v753_v8 }
 0x5d3   : > { %1234 = vmatmul.msk.f32.vlgmr.msra.gmra.mxu1 %vm272_vm1, %v1659_v4  ;;  %1235 = vmatmul.msk.f32.vlgmr.msra.gmra.mxu3 %vm272_vm1, %v1640_v0 }
 0x5db   : > { %1236 = vmatmul.msk.f32.gmra.mxu3 %vm272_vm1, %v759_v2 }
 0x650   : > { %v798_v10 = vpop.f32.mrf.mxu1 }
 0x651   : > { %v799_v15 = vadd.f32 %v798_v10, %v763_v11 }
 0x653   : > { %v807_v17 = vsub.f32 %v1587_v39, %v799_v15  ;;  %v832_v39 = vpop.permute.xlu0 %831 }
 0x656   : > { %v801_v13 = vpop.f32.mrf.mxu3 }
 0x657   : > { %v802_v16 = vadd.f32 %v801_v13, %v768_v12 }
 0x659   : > { %v808_v4 = vsub.f32 %v1583_v38, %v802_v16  ;;  %v878_v38 = vld [vmem:[%s1848_s1 + $0x168] sm:$0xff] }
 0x65a   : > { %896 = vperm.xlu2 %1317, %v878_v38  }
 0x65b   : > { %856 = vmatpush.msra.mxu2 %v808_v4  ;;  %v892_v43 = vpop.permute.xlu0 %891 }
 0x65d   : > { %857 = vmatpush.msra.mxu2 %v807_v17 }
 0x65e   : > { %1237 = vmatmul.msk.f32.vlgmr.msra.gmra.mxu2 %vm206_vm0, %v810_v45  ;;  %v1785_v40 = vpop.f32.mrf.mxu3 }
 0x663   : > { %v952_v7 = vpop.permute.xlu0 %951 }
 0x666   : > { %1238 = vmatmul.msk.f32.gmra.mxu2 %vm206_vm0, %v811_v9 }
 0x66b   : > { %v1022_v4 = vpop.permute.xlu0 %1021 }
 0x66e   : > { %1239 = vmatmul.msk.f32.gmra.mxu2 %vm206_vm0, %v812_v44 }
 0x676   : > { %1240 = vmatmul.msk.f32.gmra.mxu2 %vm206_vm0, %v1672_v3  ;;  %v875_v3 = vld [vmem:[%s1848_s1 + $0x150] sm:$0xff] }
 0x677   : > { %881 = vperm.xlu2 %1317, %v875_v3  }
 0x67f   : > { %956 = vperm.xlu2 %1317, %v942_v34  }
 0x687   : > { %1026 = vperm.xlu2 %1317, %v1008_v35  }
 0x68f   : > { %1011 = vperm.xlu2 %1317, %v1005_v36  }
 0x697   : > { %1083 = vperm.xlu2 %1317, %v1781_v37  }
 0x6b4   : > { %v897_v42 = vpop.permute.xlu2 %896 }
 0x6d1   : > { %v882_v52 = vpop.permute.xlu2 %881 }
 0x6d9   : > { %v957_v62 = vpop.permute.xlu2 %956 }
 0x6e1   : > { %v859_v14 = vpop.f32.mrf.mxu2  ;;  %v1027_v16 = vpop.permute.xlu2 %1026 }
 0x6e2   : > { %v860_v30 = vadd.f32 %v859_v14, %v817_v29 }
 0x6e4   : > { %v871_v33 = vmax.f32 %v860_v30, 0.0 }
 0x6e9   : > { %v862_v0 = vpop.f32.mrf.mxu2 }
 0x6ea   : > { %v863_v26 = vadd.f32 %v862_v0, %v822_v20 }
 0x6ec   : > { %v872_v32 = vmax.f32 %v863_v26, 0.0 }
 0x6f1   : > { %v865_v18 = vpop.f32.mrf.mxu2 }
 0x6f2   : > { %v866_v22 = vadd.f32 %v865_v18, %v827_v19 }
 0x6f4   : > { %v873_v31 = vmax.f32 %v866_v22, 0.0  ;;  %v1070_v22 = vld [vmem:[%s1848_s1 + $0x1b0] sm:$0xff] }
 0x6f9   : > { %v868_v21 = vpop.f32.mrf.mxu2 }
 0x6fa   : > { %v869_v23 = vadd.f32 %v868_v21, %v832_v39  ;;  %v1012_v39 = vpop.permute.xlu2 %1011 }
 0x6fc   : > { %v874_v28 = vmax.f32 %v869_v23, 0.0  ;;  %v1071_v23 = vld [vmem:[%s1848_s1 + $0x1b8] sm:$0xff] }
 0x6fe   : > { %919 = vmatpush.msrb.mxu3 %v874_v28 }
 0x700   : > { %920 = vmatpush.msrb.mxu3 %v873_v31 }
 0x702   : > { %921 = vmatpush.msrb.mxu3 %v872_v32  ;;  %v1084_v32 = vpop.permute.xlu2 %1083 }
 0x704   : > { %922 = vmatpush.msrb.mxu3 %v871_v33 }
 0x705   : > { %1241 = vmatmul.msk.f32.vlgmr.msrb.gmra.mxu3 %vm272_vm1, %v875_v3  ;;  %v460_v3 = vpop.permute.xlu0 %459 }
 0x706   : > { %v492_v31 = vadd.f32 %v1712_v46, %v460_v3 }
 0x70d   : > { %1242 = vmatmul.msk.f32.gmra.mxu3 %vm272_vm1, %v1717_v47  ;;  %v887_v47 = vpop.permute.xlu1 %886 }
 0x715   : > { %1243 = vmatmul.msk.f32.gmra.mxu3 %vm272_vm1, %v1678_v24  ;;  %v962_v61 = vpop.permute.xlu1 %961 }
 0x71d   : > { %1244 = vmatmul.msk.f32.gmra.mxu3 %vm272_vm1, %v878_v38 }
 0x788   : > { %v924_v5 = vpop.f32.mrf.mxu3 }
 0x789   : > { %v925_v53 = vadd.f32 %v924_v5, %v882_v52 }
 0x78b   : > { %v936_v57 = vmax.f32 %v925_v53, 0.0 }
 0x790   : > { %v927_v41 = vpop.f32.mrf.mxu3 }
 0x791   : > { %v928_v48 = vadd.f32 %v927_v41, %v887_v47 }
 0x793   : > { %v937_v56 = vmax.f32 %v928_v48, 0.0 }
 0x798   : > { %v930_v6 = vpop.f32.mrf.mxu3 }
 0x799   : > { %v931_v45 = vadd.f32 %v930_v6, %v892_v43 }
 0x79b   : > { %v938_v55 = vmax.f32 %v931_v45, 0.0 }
 0x7a0   : > { %v933_v44 = vpop.f32.mrf.mxu3 }
 0x7a1   : > { %v934_v24 = vadd.f32 %v933_v44, %v897_v42 }
 0x7a3   : > { %v939_v50 = vmax.f32 %v934_v24, 0.0 }
 0x7a5   : > { %984 = vmatpush.msrb.mxu0 %v939_v50 }
 0x7a7   : > { %985 = vmatpush.msrb.mxu0 %v938_v55 }
 0x7a9   : > { %986 = vmatpush.msrb.mxu0 %v937_v56 }
 0x7ab   : > { %987 = vmatpush.msrb.mxu0 %v936_v57 }
 0x7ac   : > { %1245 = vmatmul.msk.f32.vlgmr.msrb.gmra.mxu0 %vm272_vm1, %v1730_v51  ;;  %v947_v51 = vpop.permute.xlu1 %946 }
 0x7b4   : > { %1246 = vmatmul.msk.f32.gmra.mxu0 %vm272_vm1, %v1685_v25  ;;  %v1017_v18 = vpop.permute.xlu1 %1016 }
 0x7bc   : > { %1247 = vmatmul.msk.f32.gmra.mxu0 %vm272_vm1, %v942_v34  ;;  %v773_v29 = vpop.permute.xlu1 %772 }
 0x7bd   : > { %v805_v30 = vadd.f32 %v1785_v40, %v773_v29 }
 0x7bf   : > { %v809_v34 = vadd.f32 %v805_v30, %v492_v31 }
 0x7c4   : > { %1248 = vmatmul.msk.f32.gmra.mxu0 %vm272_vm1, %v1724_v49 }
 0x829   : > { %v989_v58 = vpop.f32.mrf.mxu0 }
 0x82a   : > { %v990_v10 = vadd.f32 %v989_v58, %v947_v51 }
 0x82c   : > { %v1001_v12 = vmax.f32 %v990_v10, 0.0 }
 0x831   : > { %v992_v59 = vpop.f32.mrf.mxu0 }
 0x832   : > { %v993_v8 = vadd.f32 %v992_v59, %v952_v7 }
 0x834   : > { %v1002_v25 = vmax.f32 %v993_v8, 0.0 }
 0x839   : > { %v995_v60 = vpop.f32.mrf.mxu0 }
 0x83a   : > { %v996_v1 = vadd.f32 %v995_v60, %v957_v62 }
 0x83c   : > { %v1003_v11 = vmax.f32 %v996_v1, 0.0 }
 0x841   : > { %v998_v63 = vpop.f32.mrf.mxu0 }
 0x842   : > { %v999_v2 = vadd.f32 %v998_v63, %v962_v61 }
 0x844   : > { %v1004_v9 = vmax.f32 %v999_v2, 0.0 }
 0x846   : > { %1049 = vmatpush.msrb.mxu1 %v1004_v9 }
 0x848   : > { %1050 = vmatpush.msrb.mxu1 %v1003_v11 }
 0x84a   : > { %1051 = vmatpush.msrb.mxu1 %v1002_v25 }
 0x84c   : > { %1052 = vmatpush.msrb.mxu1 %v1001_v12 }
 0x84d   : > { %1249 = vmatmul.msk.f32.vlgmr.msrb.gmra.mxu1 %vm272_vm1, %v1005_v36 }
 0x855   : > { %1250 = vmatmul.msk.f32.gmra.mxu1 %vm272_vm1, %v1736_v54 }
 0x85d   : > { %1251 = vmatmul.msk.f32.gmra.mxu1 %vm272_vm1, %v1695_v27 }
 0x865   : > { %1252 = vmatmul.msk.f32.gmra.mxu1 %vm272_vm1, %v1008_v35 }
 0x8ca   : > { %v1054_v49 = vpop.f32.mrf.mxu1 }
 0x8cb   : > { %v1055_v20 = vadd.f32 %v1054_v49, %v1012_v39 }
 0x8cd   : > { %v1066_v27 = vmax.f32 %v1055_v20, 0.0 }
 0x8d2   : > { %v1057_v13 = vpop.f32.mrf.mxu1 }
 0x8d3   : > { %v1058_v19 = vadd.f32 %v1057_v13, %v1017_v18 }
 0x8d5   : > { %v1067_v54 = vmax.f32 %v1058_v19, 0.0 }
 0x8da   : > { %v1060_v15 = vpop.f32.mrf.mxu1 }
 0x8db   : > { %v1061_v14 = vadd.f32 %v1060_v15, %v1022_v4 }
 0x8dd   : > { %v1068_v21 = vmax.f32 %v1061_v14, 0.0 }
 0x8e2   : > { %v1063_v17 = vpop.f32.mrf.mxu1 }
 0x8e3   : > { %v1064_v0 = vadd.f32 %v1063_v17, %v1027_v16 }
 0x8e5   : > { %v1069_v38 = vmax.f32 %v1064_v0, 0.0 }
 0x8e7   : > { %1104 = vmatpush.msrb.mxu2 %v1069_v38 }
 0x8e9   : > { %1105 = vmatpush.msrb.mxu2 %v1068_v21 }
 0x8eb   : > { %1106 = vmatpush.msrb.mxu2 %v1067_v54 }
 0x8ed   : > { %1107 = vmatpush.msrb.mxu2 %v1066_v27 }
 0x8ee   : > { %1253 = vmatmul.msk.f32.vlgmr.msrb.gmra.mxu2 %vm272_vm1, %v1070_v22 }
 0x8f6   : > { %1254 = vmatmul.msk.f32.gmra.mxu2 %vm272_vm1, %v1071_v23 }
 0x8fe   : > { %1255 = vmatmul.msk.f32.gmra.mxu2 %vm272_vm1, %v1781_v37 }
 0x971   : > { %v1109_v26 = vpop.f32.mrf.mxu2 }
 0x979   : > { %v1111_v28 = vpop.f32.mrf.mxu2 }
 0x981   : > { %v1113_v33 = vpop.f32.mrf.mxu2 }
 0x982   : > { %v1114_v35 = vadd.f32 %v1113_v33, %v1084_v32 }
 0x984   : > { %v1116_v36 = vadd.f32 %v1114_v35, %v809_v34 }
 0x986   : > { %1117 = vst [vmem:[%s179_s21] sm:$0x1] %v1116_v36 }
 0x987   : > { %1347 = shalt.err (!%p1344_p5)
}
 0x988   : > { %1262 = dma.vmem_to_hbm [thread:$0]  (%p1439_p6), %s1130_s22, 16, %s1132_s23, %s1119_s24  }
 0x989 PF: > { %s1143_s28 = sand.u32 1, %s1370_s9   ;;  %p1265_p7 = pnand %p1194_p9, %p1443_p8 }
 0x98a   : > { %s1144_s4 = scalar_lea.sflag [#allocation4], %s1143_s28 }
 0x98b   : > { %p1266_p10 = pneg %p1265_p7 }
 0x98d   : > { %1365 = dma.done.wait (%p1266_p10), %s1144_s4, 16  }
 0x98e   : > { %1367 = vsyncadd (%p1266_p10), %s1144_s4, 4294967280  ;;  %p12_p11 = scmp.ge.s32.totalorder %s1424_s15, 4   ;;  %s1852_s9 = smov %s1374_s10 }
 0x98f   : > { %s1853_s10 = smov %s1378_s11  ;;  %s1854_s11 = smov %s1437_s18 }
 0x990   : > { %s1855_s12 = smov %s1424_s15  ;;  %14 = sbr.rel (!%p12_p11) target bundleno = 3 (0x3), region = 106 }
 0x995   :  { %1149 = vsyncpa [#allocation4], 1 }
 0x996   :  { %1151 = vsyncpa [#allocation4 + $0x1], 1 }

</bundles_post_ra>
